<compile_context>
chip_gen: v5e
topology: v5e:2x2
jax: 0.10.0
libtpu: 0.0.40
codegen_flags: <defaults>
</compile_context>

<pallas_src>
import functools

import jax
import jax.numpy as jnp
from jax import lax
from jax.experimental import pallas as pl
from jax.experimental.pallas import tpu as pltpu


def basic_block_kernel(x_ref, w1_ref, b1_ref, w2_ref, b2_ref, o_ref,
                       *, H, W, Cin, C1, C2):
    """One grid step: a (Bb, Cin, H*W) block of images.

    x_ref : (Bb, Cin, HW) f32  VMEM
    w1_ref: (Cin*C1,)     f32  SMEM   conv1 weight * bn1 scale, idx = ci*C1 + c1
    b1_ref: (C1,)         f32  SMEM   folded bn1 bias
    w2_ref: (9*C1*C2,)    f32  SMEM   conv2 weight * bn2 scale,
                                      idx = ((dy+1)*3 + (dx+1))*C1*C2 + c1*C2 + c2
    b2_ref: (C2,)         f32  SMEM   folded bn2 bias
    o_ref : (Bb, C2, HW)  f32  VMEM
    """
    HW = H * W

    # ---- conv1 (1x1) + bn1 bias + LeakyReLU(0.1): VPU scalar multiply-adds.
    # Each input channel is read from VMEM exactly once.
    acc1 = [None] * C1
    for ci in range(Cin):
        xc = x_ref[:, ci, :]                               # (Bb, HW) f32
        for c1 in range(C1):
            term = w1_ref[ci * C1 + c1] * xc
            acc1[c1] = term if acc1[c1] is None else acc1[c1] + term
    h1 = []
    for c1 in range(C1):
        a = acc1[c1] + b1_ref[c1]
        h1.append(jnp.maximum(a, 0.1 * a))                 # LeakyReLU(0.1)

    # ---- hoisted edge-validity masks for the 3x3 taps (4 compares total,
    #      no integer divide: W is usually a power of two -> shift/mask).
    pos = lax.broadcasted_iota(jnp.int32, (1, HW), 1)      # p = y*W + x
    if W & (W - 1) == 0:
        yi = pos >> (W.bit_length() - 1)
        xi = pos & (W - 1)
    else:
        yi = pos // W
        xi = pos - yi * W
    y_mask = {-1: yi >= 1, 0: None, 1: yi < (H - 1)}
    x_mask = {-1: xi >= 1, 0: None, 1: xi < (W - 1)}

    # ---- conv2 (3x3, pad=1) as a 9-tap accumulate + bn2 bias + LeakyReLU
    #      + residual.  Shifts go to the XLU via pltpu.roll; out-of-image taps
    #      are zeroed with the hoisted masks.  No im2col slab is materialized.
    taps = [(dy, dx) for dy in (-1, 0, 1) for dx in (-1, 0, 1)]
    acc2 = [None] * C2
    for t, (dy, dx) in enumerate(taps):
        ym, xm = y_mask[dy], x_mask[dx]
        m = ym if xm is None else (xm if ym is None else (ym & xm))
        s = dy * W + dx
        for c1 in range(C1):
            if s == 0:
                sh = h1[c1]                                 # center tap: no mask
            else:
                sh = pltpu.roll(h1[c1], shift=(-s) % HW, axis=1)  # [:,p]=h1[:,p+s]
                sh = jnp.where(m, sh, 0.0)
            for c2 in range(C2):
                term = w2_ref[(t * C1 + c1) * C2 + c2] * sh
                acc2[c2] = term if acc2[c2] is None else acc2[c2] + term

    for c2 in range(C2):
        a = acc2[c2] + b2_ref[c2]
        a = jnp.maximum(a, 0.1 * a)                         # LeakyReLU(0.1)
        a = a + x_ref[:, c2, :]                             # residual (C2 == Cin)
        o_ref[:, c2, :] = a.astype(o_ref.dtype)


def _choose_batch_block(B, Cin, C2, HW):
    """Images per grid step: amortize per-step overhead, but keep >= 2 grid
    steps when B >= 2 (both v7x TensorCores busy) and keep the double-buffered
    in+out blocks far below the scoped-VMEM default (16 MiB on v5e)."""
    if B <= 1:
        return 1
    budget = 8 * 1024 * 1024                       # bytes for in+out blocks
    per_image = 4 * (Cin + C2) * HW * 2            # f32, double-buffered
    bb = max(1, min(B // 2, budget // max(per_image, 1)))
    while B % bb:
        bb -= 1
    return bb


def basic_block_pallas(x_nchw, w1, w2_hwio, scale1, bias1, scale2, bias2):
    """x_nchw: (B, Cin, H, W) float32 -> (B, Cin, H, W) float32."""
    B, Cin, H, W = x_nchw.shape
    C1 = w1.shape[1]
    C2 = w2_hwio.shape[3]
    assert C2 == Cin, "residual add requires planes[1] == inplanes"
    HW = H * W

    # Free reshape (no transpose): channels stay on sublanes, spatial on lanes.
    x_flat = x_nchw.reshape(B, Cin, HW)

    # Fold the BN scales into the (tiny) conv weights; only biases stay.
    w1f = (w1 * scale1[None, :]).astype(jnp.float32).reshape(Cin * C1)
    w2f = (w2_hwio * scale2[None, None, None, :]).astype(jnp.float32)
    w2f = w2f.reshape(9 * C1 * C2)          # ((dy+1)*3+(dx+1), c1, c2) row-major
    b1 = bias1.astype(jnp.float32).reshape(C1)
    b2 = bias2.astype(jnp.float32).reshape(C2)

    Bb = _choose_batch_block(B, Cin, C2, HW)
    grid = (B // Bb,)

    flops = B * HW * (2 * Cin * C1 + 2 * 9 * C1 * C2 + 4 * (C1 + C2))
    bytes_accessed = 4 * (B * HW * (Cin + C2)
                          + Cin * C1 + 9 * C1 * C2 + C1 + C2)

    # NOTE: for real Darknet spatial sizes, add a second grid axis over HW
    # ("parallel" where independent) with a halo-aware index_map and a lane
    # tile that is a multiple of 128 (>= 512 preferred) so blocks stay under
    # VMEM (64 MiB/TC on v7x) while remaining lane-dense; also size
    # vmem_limit_bytes to the actual block usage on v5e once blocks grow.
    kernel = functools.partial(basic_block_kernel, H=H, W=W,
                               Cin=Cin, C1=C1, C2=C2)
    smem_spec = pl.BlockSpec(memory_space=pltpu.MemorySpace.SMEM)
    out_flat = pl.pallas_call(
        kernel,
        out_shape=jax.ShapeDtypeStruct((B, C2, HW), x_nchw.dtype),
        grid=grid,
        in_specs=[
            pl.BlockSpec((Bb, Cin, HW), lambda b: (b, 0, 0)),   # x block
            smem_spec,                                          # w1 (folded)
            smem_spec,                                          # b1
            smem_spec,                                          # w2 (folded)
            smem_spec,                                          # b2
        ],
        out_specs=pl.BlockSpec((Bb, C2, HW), lambda b: (b, 0, 0)),
        compiler_params=pltpu.CompilerParams(
            dimension_semantics=("parallel",)),
        cost_estimate=pl.CostEstimate(
            flops=flops, transcendentals=0, bytes_accessed=bytes_accessed),
    )(x_flat, w1f, b1, w2f, b2)

    return out_flat.reshape(B, C2, H, W)     # free reshape back to NCHW


def basic_block_reference(x_nchw, w1, w2_hwio, scale1, bias1, scale2, bias2):
    """Plain-JAX f32 reference for correctness checking."""
    x = jnp.transpose(x_nchw, (0, 2, 3, 1))               # NHWC
    h = jnp.einsum('bhwc,cd->bhwd', x, w1, precision=lax.Precision.HIGHEST)
    h = h * scale1 + bias1
    h = jnp.where(h > 0, h, 0.1 * h)
    h = lax.conv_general_dilated(h, w2_hwio, (1, 1), 'SAME',
                                 dimension_numbers=('NHWC', 'HWIO', 'NHWC'),
                                 precision=lax.Precision.HIGHEST)
    h = h * scale2 + bias2
    h = jnp.where(h > 0, h, 0.1 * h)
    h = h + x
    return jnp.transpose(h, (0, 3, 1, 2))


if __name__ == "__main__":
    # BasicBlock(inplanes=4, planes=[2, 4]); input (B=2, C=4, H=W=16), NCHW.
    B, Cin, H, W = 2, 4, 16, 16
    planes = (2, 4)
    C1, C2 = planes
    eps = 1e-5  # PyTorch BatchNorm2d default

    key = jax.random.PRNGKey(0)
    k = jax.random.split(key, 10)

    x = jax.random.normal(k[0], (B, Cin, H, W), jnp.float32)

    # conv weights (synthetic, deterministic). w2 generated directly in HWIO.
    w1 = jax.random.normal(k[1], (Cin, C1), jnp.float32) * 0.2
    w2_hwio = jax.random.normal(k[2], (3, 3, C1, C2), jnp.float32) * 0.2

    # BatchNorm parameters (eval mode; folded into scale/bias).
    gamma1 = 1.0 + 0.1 * jax.random.normal(k[3], (C1,), jnp.float32)
    beta1 = 0.1 * jax.random.normal(k[4], (C1,), jnp.float32)
    mean1 = 0.1 * jax.random.normal(k[5], (C1,), jnp.float32)
    var1 = jnp.abs(jax.random.normal(k[6], (C1,), jnp.float32)) + 0.5

    gamma2 = 1.0 + 0.1 * jax.random.normal(k[7], (C2,), jnp.float32)
    beta2 = 0.1 * jax.random.normal(k[8], (C2,), jnp.float32)
    mean2 = 0.1 * jax.random.normal(k[9], (C2,), jnp.float32)
    var2 = jnp.abs(jax.random.normal(k[3], (C2,), jnp.float32)) + 0.5

    scale1 = gamma1 / jnp.sqrt(var1 + eps)
    bias1 = beta1 - mean1 * scale1
    scale2 = gamma2 / jnp.sqrt(var2 + eps)
    bias2 = beta2 - mean2 * scale2

    out = basic_block_pallas(x, w1, w2_hwio, scale1, bias1, scale2, bias2)
    out = jax.block_until_ready(out)

    ref = basic_block_reference(x, w1, w2_hwio, scale1, bias1, scale2, bias2)
    ref = jax.block_until_ready(ref)

    assert out.shape == (B, Cin, H, W)
    # Kernel is fully f32 now (BN-scale folding only reorders f32 rounding),
    # so the tolerance against the f32 reference can be tight.
    assert jnp.allclose(out, ref, atol=1e-4, rtol=1e-4), (
        float(jnp.max(jnp.abs(out - ref))))

    print("KERNEL_OK")
</pallas_src>

<mosaic_0001>
module attributes {stable_mosaic.version = 11 : i64} {
  func.func @basic_block_kernel(%arg0: i32, %arg1: memref<1x4x256xf32, #tpu.memory_space<vmem>>, %arg2: memref<8xf32, #tpu.memory_space<smem>>, %arg3: memref<2xf32, #tpu.memory_space<smem>>, %arg4: memref<72xf32, #tpu.memory_space<smem>>, %arg5: memref<4xf32, #tpu.memory_space<smem>>, %arg6: memref<1x4x256xf32, #tpu.memory_space<vmem>>) attributes {dimension_semantics = [#tpu.dimension_semantics<parallel>], iteration_bounds = array<i64: 2>, scalar_prefetch = 0 : i64, scratch_operands = 0 : i64, tpu.core_type = #tpu.core_type<tc>, window_params = [{transform_indices = @transform_0, window_bounds = array<i64: 1, 4, 256>}, {transform_indices = @transform_1, window_bounds = array<i64: 8>}, {transform_indices = @transform_2, window_bounds = array<i64: 2>}, {transform_indices = @transform_3, window_bounds = array<i64: 72>}, {transform_indices = @transform_4, window_bounds = array<i64: 4>}, {transform_indices = @transform_5, window_bounds = array<i64: 1, 4, 256>}]} {
    %c0 = arith.constant 0 : index
    %c0_0 = arith.constant 0 : index
    %c0_1 = arith.constant 0 : index
    %0 = vector.load %arg1[%c0, %c0_0, %c0_1] : memref<1x4x256xf32, #tpu.memory_space<vmem>>, vector<1x1x256xf32>
    %1 = vector.shape_cast %0 : vector<1x1x256xf32> to vector<1x256xf32>
    %c0_2 = arith.constant 0 : index
    %2 = memref.load %arg2[%c0_2] : memref<8xf32, #tpu.memory_space<smem>>
    %3 = vector.broadcast %2 : f32 to vector<1x256xf32>
    %4 = arith.mulf %3, %1 : vector<1x256xf32>
    %c1 = arith.constant 1 : index
    %5 = memref.load %arg2[%c1] : memref<8xf32, #tpu.memory_space<smem>>
    %6 = vector.broadcast %5 : f32 to vector<1x256xf32>
    %7 = arith.mulf %6, %1 : vector<1x256xf32>
    %c0_3 = arith.constant 0 : index
    %c1_4 = arith.constant 1 : index
    %c0_5 = arith.constant 0 : index
    %8 = vector.load %arg1[%c0_3, %c1_4, %c0_5] : memref<1x4x256xf32, #tpu.memory_space<vmem>>, vector<1x1x256xf32>
    %9 = vector.shape_cast %8 : vector<1x1x256xf32> to vector<1x256xf32>
    %c2 = arith.constant 2 : index
    %10 = memref.load %arg2[%c2] : memref<8xf32, #tpu.memory_space<smem>>
    %11 = vector.broadcast %10 : f32 to vector<1x256xf32>
    %12 = arith.mulf %11, %9 : vector<1x256xf32>
    %13 = arith.addf %4, %12 : vector<1x256xf32>
    %c3 = arith.constant 3 : index
    %14 = memref.load %arg2[%c3] : memref<8xf32, #tpu.memory_space<smem>>
    %15 = vector.broadcast %14 : f32 to vector<1x256xf32>
    %16 = arith.mulf %15, %9 : vector<1x256xf32>
    %17 = arith.addf %7, %16 : vector<1x256xf32>
    %c0_6 = arith.constant 0 : index
    %c2_7 = arith.constant 2 : index
    %c0_8 = arith.constant 0 : index
    %18 = vector.load %arg1[%c0_6, %c2_7, %c0_8] : memref<1x4x256xf32, #tpu.memory_space<vmem>>, vector<1x1x256xf32>
    %19 = vector.shape_cast %18 : vector<1x1x256xf32> to vector<1x256xf32>
    %c4 = arith.constant 4 : index
    %20 = memref.load %arg2[%c4] : memref<8xf32, #tpu.memory_space<smem>>
    %21 = vector.broadcast %20 : f32 to vector<1x256xf32>
    %22 = arith.mulf %21, %19 : vector<1x256xf32>
    %23 = arith.addf %13, %22 : vector<1x256xf32>
    %c5 = arith.constant 5 : index
    %24 = memref.load %arg2[%c5] : memref<8xf32, #tpu.memory_space<smem>>
    %25 = vector.broadcast %24 : f32 to vector<1x256xf32>
    %26 = arith.mulf %25, %19 : vector<1x256xf32>
    %27 = arith.addf %17, %26 : vector<1x256xf32>
    %c0_9 = arith.constant 0 : index
    %c3_10 = arith.constant 3 : index
    %c0_11 = arith.constant 0 : index
    %28 = vector.load %arg1[%c0_9, %c3_10, %c0_11] : memref<1x4x256xf32, #tpu.memory_space<vmem>>, vector<1x1x256xf32>
    %29 = vector.shape_cast %28 : vector<1x1x256xf32> to vector<1x256xf32>
    %c6 = arith.constant 6 : index
    %30 = memref.load %arg2[%c6] : memref<8xf32, #tpu.memory_space<smem>>
    %31 = vector.broadcast %30 : f32 to vector<1x256xf32>
    %32 = arith.mulf %31, %29 : vector<1x256xf32>
    %33 = arith.addf %23, %32 : vector<1x256xf32>
    %c7 = arith.constant 7 : index
    %34 = memref.load %arg2[%c7] : memref<8xf32, #tpu.memory_space<smem>>
    %35 = vector.broadcast %34 : f32 to vector<1x256xf32>
    %36 = arith.mulf %35, %29 : vector<1x256xf32>
    %37 = arith.addf %27, %36 : vector<1x256xf32>
    %c0_12 = arith.constant 0 : index
    %38 = memref.load %arg3[%c0_12] : memref<2xf32, #tpu.memory_space<smem>>
    %39 = vector.broadcast %38 : f32 to vector<1x256xf32>
    %40 = arith.addf %33, %39 : vector<1x256xf32>
    %cst = arith.constant 1.000000e-01 : f32
    %41 = vector.broadcast %cst : f32 to vector<1x256xf32>
    %42 = arith.mulf %41, %40 : vector<1x256xf32>
    %43 = arith.maximumf %40, %42 : vector<1x256xf32>
    %c1_13 = arith.constant 1 : index
    %44 = memref.load %arg3[%c1_13] : memref<2xf32, #tpu.memory_space<smem>>
    %45 = vector.broadcast %44 : f32 to vector<1x256xf32>
    %46 = arith.addf %37, %45 : vector<1x256xf32>
    %cst_14 = arith.constant 1.000000e-01 : f32
    %47 = vector.broadcast %cst_14 : f32 to vector<1x256xf32>
    %48 = arith.mulf %47, %46 : vector<1x256xf32>
    %49 = arith.maximumf %46, %48 : vector<1x256xf32>
    %50 = tpu.iota {dimensions = array<i32: 1>} : vector<1x256xi32>
    %c4_i32 = arith.constant 4 : i32
    %51 = vector.broadcast %c4_i32 : i32 to vector<1x256xi32>
    %52 = arith.shrsi %50, %51 : vector<1x256xi32>
    %c15_i32 = arith.constant 15 : i32
    %53 = vector.broadcast %c15_i32 : i32 to vector<1x256xi32>
    %54 = arith.andi %50, %53 : vector<1x256xi32>
    %c1_i32 = arith.constant 1 : i32
    %55 = vector.broadcast %c1_i32 : i32 to vector<1x256xi32>
    %56 = arith.cmpi sge, %52, %55 : vector<1x256xi32>
    %c15_i32_15 = arith.constant 15 : i32
    %57 = vector.broadcast %c15_i32_15 : i32 to vector<1x256xi32>
    %58 = arith.cmpi slt, %52, %57 : vector<1x256xi32>
    %c1_i32_16 = arith.constant 1 : i32
    %59 = vector.broadcast %c1_i32_16 : i32 to vector<1x256xi32>
    %60 = arith.cmpi sge, %54, %59 : vector<1x256xi32>
    %c15_i32_17 = arith.constant 15 : i32
    %61 = vector.broadcast %c15_i32_17 : i32 to vector<1x256xi32>
    %62 = arith.cmpi slt, %54, %61 : vector<1x256xi32>
    %63 = arith.andi %56, %60 : vector<1x256xi1>
    %c17_i32 = arith.constant 17 : i32
    %64 = tpu.dynamic_rotate %43 by %c17_i32 dim 1 : vector<1x256xf32>, i32 -> vector<1x256xf32>
    %cst_18 = arith.constant 0.000000e+00 : f32
    %65 = vector.broadcast %cst_18 : f32 to vector<1x256xf32>
    %66 = arith.select %63, %64, %65 : vector<1x256xi1>, vector<1x256xf32>
    %c0_19 = arith.constant 0 : index
    %67 = memref.load %arg4[%c0_19] : memref<72xf32, #tpu.memory_space<smem>>
    %68 = vector.broadcast %67 : f32 to vector<1x256xf32>
    %69 = arith.mulf %68, %66 : vector<1x256xf32>
    %c1_20 = arith.constant 1 : index
    %70 = memref.load %arg4[%c1_20] : memref<72xf32, #tpu.memory_space<smem>>
    %71 = vector.broadcast %70 : f32 to vector<1x256xf32>
    %72 = arith.mulf %71, %66 : vector<1x256xf32>
    %c2_21 = arith.constant 2 : index
    %73 = memref.load %arg4[%c2_21] : memref<72xf32, #tpu.memory_space<smem>>
    %74 = vector.broadcast %73 : f32 to vector<1x256xf32>
    %75 = arith.mulf %74, %66 : vector<1x256xf32>
    %c3_22 = arith.constant 3 : index
    %76 = memref.load %arg4[%c3_22] : memref<72xf32, #tpu.memory_space<smem>>
    %77 = vector.broadcast %76 : f32 to vector<1x256xf32>
    %78 = arith.mulf %77, %66 : vector<1x256xf32>
    %c17_i32_23 = arith.constant 17 : i32
    %79 = tpu.dynamic_rotate %49 by %c17_i32_23 dim 1 : vector<1x256xf32>, i32 -> vector<1x256xf32>
    %cst_24 = arith.constant 0.000000e+00 : f32
    %80 = vector.broadcast %cst_24 : f32 to vector<1x256xf32>
    %81 = arith.select %63, %79, %80 : vector<1x256xi1>, vector<1x256xf32>
    %c4_25 = arith.constant 4 : index
    %82 = memref.load %arg4[%c4_25] : memref<72xf32, #tpu.memory_space<smem>>
    %83 = vector.broadcast %82 : f32 to vector<1x256xf32>
    %84 = arith.mulf %83, %81 : vector<1x256xf32>
    %85 = arith.addf %69, %84 : vector<1x256xf32>
    %c5_26 = arith.constant 5 : index
    %86 = memref.load %arg4[%c5_26] : memref<72xf32, #tpu.memory_space<smem>>
    %87 = vector.broadcast %86 : f32 to vector<1x256xf32>
    %88 = arith.mulf %87, %81 : vector<1x256xf32>
    %89 = arith.addf %72, %88 : vector<1x256xf32>
    %c6_27 = arith.constant 6 : index
    %90 = memref.load %arg4[%c6_27] : memref<72xf32, #tpu.memory_space<smem>>
    %91 = vector.broadcast %90 : f32 to vector<1x256xf32>
    %92 = arith.mulf %91, %81 : vector<1x256xf32>
    %93 = arith.addf %75, %92 : vector<1x256xf32>
    %c7_28 = arith.constant 7 : index
    %94 = memref.load %arg4[%c7_28] : memref<72xf32, #tpu.memory_space<smem>>
    %95 = vector.broadcast %94 : f32 to vector<1x256xf32>
    %96 = arith.mulf %95, %81 : vector<1x256xf32>
    %97 = arith.addf %78, %96 : vector<1x256xf32>
    %c16_i32 = arith.constant 16 : i32
    %98 = tpu.dynamic_rotate %43 by %c16_i32 dim 1 : vector<1x256xf32>, i32 -> vector<1x256xf32>
    %cst_29 = arith.constant 0.000000e+00 : f32
    %99 = vector.broadcast %cst_29 : f32 to vector<1x256xf32>
    %100 = arith.select %56, %98, %99 : vector<1x256xi1>, vector<1x256xf32>
    %c8 = arith.constant 8 : index
    %101 = memref.load %arg4[%c8] : memref<72xf32, #tpu.memory_space<smem>>
    %102 = vector.broadcast %101 : f32 to vector<1x256xf32>
    %103 = arith.mulf %102, %100 : vector<1x256xf32>
    %104 = arith.addf %85, %103 : vector<1x256xf32>
    %c9 = arith.constant 9 : index
    %105 = memref.load %arg4[%c9] : memref<72xf32, #tpu.memory_space<smem>>
    %106 = vector.broadcast %105 : f32 to vector<1x256xf32>
    %107 = arith.mulf %106, %100 : vector<1x256xf32>
    %108 = arith.addf %89, %107 : vector<1x256xf32>
    %c10 = arith.constant 10 : index
    %109 = memref.load %arg4[%c10] : memref<72xf32, #tpu.memory_space<smem>>
    %110 = vector.broadcast %109 : f32 to vector<1x256xf32>
    %111 = arith.mulf %110, %100 : vector<1x256xf32>
    %112 = arith.addf %93, %111 : vector<1x256xf32>
    %c11 = arith.constant 11 : index
    %113 = memref.load %arg4[%c11] : memref<72xf32, #tpu.memory_space<smem>>
    %114 = vector.broadcast %113 : f32 to vector<1x256xf32>
    %115 = arith.mulf %114, %100 : vector<1x256xf32>
    %116 = arith.addf %97, %115 : vector<1x256xf32>
    %c16_i32_30 = arith.constant 16 : i32
    %117 = tpu.dynamic_rotate %49 by %c16_i32_30 dim 1 : vector<1x256xf32>, i32 -> vector<1x256xf32>
    %cst_31 = arith.constant 0.000000e+00 : f32
    %118 = vector.broadcast %cst_31 : f32 to vector<1x256xf32>
    %119 = arith.select %56, %117, %118 : vector<1x256xi1>, vector<1x256xf32>
    %c12 = arith.constant 12 : index
    %120 = memref.load %arg4[%c12] : memref<72xf32, #tpu.memory_space<smem>>
    %121 = vector.broadcast %120 : f32 to vector<1x256xf32>
    %122 = arith.mulf %121, %119 : vector<1x256xf32>
    %123 = arith.addf %104, %122 : vector<1x256xf32>
    %c13 = arith.constant 13 : index
    %124 = memref.load %arg4[%c13] : memref<72xf32, #tpu.memory_space<smem>>
    %125 = vector.broadcast %124 : f32 to vector<1x256xf32>
    %126 = arith.mulf %125, %119 : vector<1x256xf32>
    %127 = arith.addf %108, %126 : vector<1x256xf32>
    %c14 = arith.constant 14 : index
    %128 = memref.load %arg4[%c14] : memref<72xf32, #tpu.memory_space<smem>>
    %129 = vector.broadcast %128 : f32 to vector<1x256xf32>
    %130 = arith.mulf %129, %119 : vector<1x256xf32>
    %131 = arith.addf %112, %130 : vector<1x256xf32>
    %c15 = arith.constant 15 : index
    %132 = memref.load %arg4[%c15] : memref<72xf32, #tpu.memory_space<smem>>
    %133 = vector.broadcast %132 : f32 to vector<1x256xf32>
    %134 = arith.mulf %133, %119 : vector<1x256xf32>
    %135 = arith.addf %116, %134 : vector<1x256xf32>
    %136 = arith.andi %56, %62 : vector<1x256xi1>
    %c15_i32_32 = arith.constant 15 : i32
    %137 = tpu.dynamic_rotate %43 by %c15_i32_32 dim 1 : vector<1x256xf32>, i32 -> vector<1x256xf32>
    %cst_33 = arith.constant 0.000000e+00 : f32
    %138 = vector.broadcast %cst_33 : f32 to vector<1x256xf32>
    %139 = arith.select %136, %137, %138 : vector<1x256xi1>, vector<1x256xf32>
    %c16 = arith.constant 16 : index
    %140 = memref.load %arg4[%c16] : memref<72xf32, #tpu.memory_space<smem>>
    %141 = vector.broadcast %140 : f32 to vector<1x256xf32>
    %142 = arith.mulf %141, %139 : vector<1x256xf32>
    %143 = arith.addf %123, %142 : vector<1x256xf32>
    %c17 = arith.constant 17 : index
    %144 = memref.load %arg4[%c17] : memref<72xf32, #tpu.memory_space<smem>>
    %145 = vector.broadcast %144 : f32 to vector<1x256xf32>
    %146 = arith.mulf %145, %139 : vector<1x256xf32>
    %147 = arith.addf %127, %146 : vector<1x256xf32>
    %c18 = arith.constant 18 : index
    %148 = memref.load %arg4[%c18] : memref<72xf32, #tpu.memory_space<smem>>
    %149 = vector.broadcast %148 : f32 to vector<1x256xf32>
    %150 = arith.mulf %149, %139 : vector<1x256xf32>
    %151 = arith.addf %131, %150 : vector<1x256xf32>
    %c19 = arith.constant 19 : index
    %152 = memref.load %arg4[%c19] : memref<72xf32, #tpu.memory_space<smem>>
    %153 = vector.broadcast %152 : f32 to vector<1x256xf32>
    %154 = arith.mulf %153, %139 : vector<1x256xf32>
    %155 = arith.addf %135, %154 : vector<1x256xf32>
    %c15_i32_34 = arith.constant 15 : i32
    %156 = tpu.dynamic_rotate %49 by %c15_i32_34 dim 1 : vector<1x256xf32>, i32 -> vector<1x256xf32>
    %cst_35 = arith.constant 0.000000e+00 : f32
    %157 = vector.broadcast %cst_35 : f32 to vector<1x256xf32>
    %158 = arith.select %136, %156, %157 : vector<1x256xi1>, vector<1x256xf32>
    %c20 = arith.constant 20 : index
    %159 = memref.load %arg4[%c20] : memref<72xf32, #tpu.memory_space<smem>>
    %160 = vector.broadcast %159 : f32 to vector<1x256xf32>
    %161 = arith.mulf %160, %158 : vector<1x256xf32>
    %162 = arith.addf %143, %161 : vector<1x256xf32>
    %c21 = arith.constant 21 : index
    %163 = memref.load %arg4[%c21] : memref<72xf32, #tpu.memory_space<smem>>
    %164 = vector.broadcast %163 : f32 to vector<1x256xf32>
    %165 = arith.mulf %164, %158 : vector<1x256xf32>
    %166 = arith.addf %147, %165 : vector<1x256xf32>
    %c22 = arith.constant 22 : index
    %167 = memref.load %arg4[%c22] : memref<72xf32, #tpu.memory_space<smem>>
    %168 = vector.broadcast %167 : f32 to vector<1x256xf32>
    %169 = arith.mulf %168, %158 : vector<1x256xf32>
    %170 = arith.addf %151, %169 : vector<1x256xf32>
    %c23 = arith.constant 23 : index
    %171 = memref.load %arg4[%c23] : memref<72xf32, #tpu.memory_space<smem>>
    %172 = vector.broadcast %171 : f32 to vector<1x256xf32>
    %173 = arith.mulf %172, %158 : vector<1x256xf32>
    %174 = arith.addf %155, %173 : vector<1x256xf32>
    %c1_i32_36 = arith.constant 1 : i32
    %175 = tpu.dynamic_rotate %43 by %c1_i32_36 dim 1 : vector<1x256xf32>, i32 -> vector<1x256xf32>
    %cst_37 = arith.constant 0.000000e+00 : f32
    %176 = vector.broadcast %cst_37 : f32 to vector<1x256xf32>
    %177 = arith.select %60, %175, %176 : vector<1x256xi1>, vector<1x256xf32>
    %c24 = arith.constant 24 : index
    %178 = memref.load %arg4[%c24] : memref<72xf32, #tpu.memory_space<smem>>
    %179 = vector.broadcast %178 : f32 to vector<1x256xf32>
    %180 = arith.mulf %179, %177 : vector<1x256xf32>
    %181 = arith.addf %162, %180 : vector<1x256xf32>
    %c25 = arith.constant 25 : index
    %182 = memref.load %arg4[%c25] : memref<72xf32, #tpu.memory_space<smem>>
    %183 = vector.broadcast %182 : f32 to vector<1x256xf32>
    %184 = arith.mulf %183, %177 : vector<1x256xf32>
    %185 = arith.addf %166, %184 : vector<1x256xf32>
    %c26 = arith.constant 26 : index
    %186 = memref.load %arg4[%c26] : memref<72xf32, #tpu.memory_space<smem>>
    %187 = vector.broadcast %186 : f32 to vector<1x256xf32>
    %188 = arith.mulf %187, %177 : vector<1x256xf32>
    %189 = arith.addf %170, %188 : vector<1x256xf32>
    %c27 = arith.constant 27 : index
    %190 = memref.load %arg4[%c27] : memref<72xf32, #tpu.memory_space<smem>>
    %191 = vector.broadcast %190 : f32 to vector<1x256xf32>
    %192 = arith.mulf %191, %177 : vector<1x256xf32>
    %193 = arith.addf %174, %192 : vector<1x256xf32>
    %c1_i32_38 = arith.constant 1 : i32
    %194 = tpu.dynamic_rotate %49 by %c1_i32_38 dim 1 : vector<1x256xf32>, i32 -> vector<1x256xf32>
    %cst_39 = arith.constant 0.000000e+00 : f32
    %195 = vector.broadcast %cst_39 : f32 to vector<1x256xf32>
    %196 = arith.select %60, %194, %195 : vector<1x256xi1>, vector<1x256xf32>
    %c28 = arith.constant 28 : index
    %197 = memref.load %arg4[%c28] : memref<72xf32, #tpu.memory_space<smem>>
    %198 = vector.broadcast %197 : f32 to vector<1x256xf32>
    %199 = arith.mulf %198, %196 : vector<1x256xf32>
    %200 = arith.addf %181, %199 : vector<1x256xf32>
    %c29 = arith.constant 29 : index
    %201 = memref.load %arg4[%c29] : memref<72xf32, #tpu.memory_space<smem>>
    %202 = vector.broadcast %201 : f32 to vector<1x256xf32>
    %203 = arith.mulf %202, %196 : vector<1x256xf32>
    %204 = arith.addf %185, %203 : vector<1x256xf32>
    %c30 = arith.constant 30 : index
    %205 = memref.load %arg4[%c30] : memref<72xf32, #tpu.memory_space<smem>>
    %206 = vector.broadcast %205 : f32 to vector<1x256xf32>
    %207 = arith.mulf %206, %196 : vector<1x256xf32>
    %208 = arith.addf %189, %207 : vector<1x256xf32>
    %c31 = arith.constant 31 : index
    %209 = memref.load %arg4[%c31] : memref<72xf32, #tpu.memory_space<smem>>
    %210 = vector.broadcast %209 : f32 to vector<1x256xf32>
    %211 = arith.mulf %210, %196 : vector<1x256xf32>
    %212 = arith.addf %193, %211 : vector<1x256xf32>
    %c32 = arith.constant 32 : index
    %213 = memref.load %arg4[%c32] : memref<72xf32, #tpu.memory_space<smem>>
    %214 = vector.broadcast %213 : f32 to vector<1x256xf32>
    %215 = arith.mulf %214, %43 : vector<1x256xf32>
    %216 = arith.addf %200, %215 : vector<1x256xf32>
    %c33 = arith.constant 33 : index
    %217 = memref.load %arg4[%c33] : memref<72xf32, #tpu.memory_space<smem>>
    %218 = vector.broadcast %217 : f32 to vector<1x256xf32>
    %219 = arith.mulf %218, %43 : vector<1x256xf32>
    %220 = arith.addf %204, %219 : vector<1x256xf32>
    %c34 = arith.constant 34 : index
    %221 = memref.load %arg4[%c34] : memref<72xf32, #tpu.memory_space<smem>>
    %222 = vector.broadcast %221 : f32 to vector<1x256xf32>
    %223 = arith.mulf %222, %43 : vector<1x256xf32>
    %224 = arith.addf %208, %223 : vector<1x256xf32>
    %c35 = arith.constant 35 : index
    %225 = memref.load %arg4[%c35] : memref<72xf32, #tpu.memory_space<smem>>
    %226 = vector.broadcast %225 : f32 to vector<1x256xf32>
    %227 = arith.mulf %226, %43 : vector<1x256xf32>
    %228 = arith.addf %212, %227 : vector<1x256xf32>
    %c36 = arith.constant 36 : index
    %229 = memref.load %arg4[%c36] : memref<72xf32, #tpu.memory_space<smem>>
    %230 = vector.broadcast %229 : f32 to vector<1x256xf32>
    %231 = arith.mulf %230, %49 : vector<1x256xf32>
    %232 = arith.addf %216, %231 : vector<1x256xf32>
    %c37 = arith.constant 37 : index
    %233 = memref.load %arg4[%c37] : memref<72xf32, #tpu.memory_space<smem>>
    %234 = vector.broadcast %233 : f32 to vector<1x256xf32>
    %235 = arith.mulf %234, %49 : vector<1x256xf32>
    %236 = arith.addf %220, %235 : vector<1x256xf32>
    %c38 = arith.constant 38 : index
    %237 = memref.load %arg4[%c38] : memref<72xf32, #tpu.memory_space<smem>>
    %238 = vector.broadcast %237 : f32 to vector<1x256xf32>
    %239 = arith.mulf %238, %49 : vector<1x256xf32>
    %240 = arith.addf %224, %239 : vector<1x256xf32>
    %c39 = arith.constant 39 : index
    %241 = memref.load %arg4[%c39] : memref<72xf32, #tpu.memory_space<smem>>
    %242 = vector.broadcast %241 : f32 to vector<1x256xf32>
    %243 = arith.mulf %242, %49 : vector<1x256xf32>
    %244 = arith.addf %228, %243 : vector<1x256xf32>
    %c255_i32 = arith.constant 255 : i32
    %245 = tpu.dynamic_rotate %43 by %c255_i32 dim 1 : vector<1x256xf32>, i32 -> vector<1x256xf32>
    %cst_40 = arith.constant 0.000000e+00 : f32
    %246 = vector.broadcast %cst_40 : f32 to vector<1x256xf32>
    %247 = arith.select %62, %245, %246 : vector<1x256xi1>, vector<1x256xf32>
    %c40 = arith.constant 40 : index
    %248 = memref.load %arg4[%c40] : memref<72xf32, #tpu.memory_space<smem>>
    %249 = vector.broadcast %248 : f32 to vector<1x256xf32>
    %250 = arith.mulf %249, %247 : vector<1x256xf32>
    %251 = arith.addf %232, %250 : vector<1x256xf32>
    %c41 = arith.constant 41 : index
    %252 = memref.load %arg4[%c41] : memref<72xf32, #tpu.memory_space<smem>>
    %253 = vector.broadcast %252 : f32 to vector<1x256xf32>
    %254 = arith.mulf %253, %247 : vector<1x256xf32>
    %255 = arith.addf %236, %254 : vector<1x256xf32>
    %c42 = arith.constant 42 : index
    %256 = memref.load %arg4[%c42] : memref<72xf32, #tpu.memory_space<smem>>
    %257 = vector.broadcast %256 : f32 to vector<1x256xf32>
    %258 = arith.mulf %257, %247 : vector<1x256xf32>
    %259 = arith.addf %240, %258 : vector<1x256xf32>
    %c43 = arith.constant 43 : index
    %260 = memref.load %arg4[%c43] : memref<72xf32, #tpu.memory_space<smem>>
    %261 = vector.broadcast %260 : f32 to vector<1x256xf32>
    %262 = arith.mulf %261, %247 : vector<1x256xf32>
    %263 = arith.addf %244, %262 : vector<1x256xf32>
    %c255_i32_41 = arith.constant 255 : i32
    %264 = tpu.dynamic_rotate %49 by %c255_i32_41 dim 1 : vector<1x256xf32>, i32 -> vector<1x256xf32>
    %cst_42 = arith.constant 0.000000e+00 : f32
    %265 = vector.broadcast %cst_42 : f32 to vector<1x256xf32>
    %266 = arith.select %62, %264, %265 : vector<1x256xi1>, vector<1x256xf32>
    %c44 = arith.constant 44 : index
    %267 = memref.load %arg4[%c44] : memref<72xf32, #tpu.memory_space<smem>>
    %268 = vector.broadcast %267 : f32 to vector<1x256xf32>
    %269 = arith.mulf %268, %266 : vector<1x256xf32>
    %270 = arith.addf %251, %269 : vector<1x256xf32>
    %c45 = arith.constant 45 : index
    %271 = memref.load %arg4[%c45] : memref<72xf32, #tpu.memory_space<smem>>
    %272 = vector.broadcast %271 : f32 to vector<1x256xf32>
    %273 = arith.mulf %272, %266 : vector<1x256xf32>
    %274 = arith.addf %255, %273 : vector<1x256xf32>
    %c46 = arith.constant 46 : index
    %275 = memref.load %arg4[%c46] : memref<72xf32, #tpu.memory_space<smem>>
    %276 = vector.broadcast %275 : f32 to vector<1x256xf32>
    %277 = arith.mulf %276, %266 : vector<1x256xf32>
    %278 = arith.addf %259, %277 : vector<1x256xf32>
    %c47 = arith.constant 47 : index
    %279 = memref.load %arg4[%c47] : memref<72xf32, #tpu.memory_space<smem>>
    %280 = vector.broadcast %279 : f32 to vector<1x256xf32>
    %281 = arith.mulf %280, %266 : vector<1x256xf32>
    %282 = arith.addf %263, %281 : vector<1x256xf32>
    %283 = arith.andi %58, %60 : vector<1x256xi1>
    %c241_i32 = arith.constant 241 : i32
    %284 = tpu.dynamic_rotate %43 by %c241_i32 dim 1 : vector<1x256xf32>, i32 -> vector<1x256xf32>
    %cst_43 = arith.constant 0.000000e+00 : f32
    %285 = vector.broadcast %cst_43 : f32 to vector<1x256xf32>
    %286 = arith.select %283, %284, %285 : vector<1x256xi1>, vector<1x256xf32>
    %c48 = arith.constant 48 : index
    %287 = memref.load %arg4[%c48] : memref<72xf32, #tpu.memory_space<smem>>
    %288 = vector.broadcast %287 : f32 to vector<1x256xf32>
    %289 = arith.mulf %288, %286 : vector<1x256xf32>
    %290 = arith.addf %270, %289 : vector<1x256xf32>
    %c49 = arith.constant 49 : index
    %291 = memref.load %arg4[%c49] : memref<72xf32, #tpu.memory_space<smem>>
    %292 = vector.broadcast %291 : f32 to vector<1x256xf32>
    %293 = arith.mulf %292, %286 : vector<1x256xf32>
    %294 = arith.addf %274, %293 : vector<1x256xf32>
    %c50 = arith.constant 50 : index
    %295 = memref.load %arg4[%c50] : memref<72xf32, #tpu.memory_space<smem>>
    %296 = vector.broadcast %295 : f32 to vector<1x256xf32>
    %297 = arith.mulf %296, %286 : vector<1x256xf32>
    %298 = arith.addf %278, %297 : vector<1x256xf32>
    %c51 = arith.constant 51 : index
    %299 = memref.load %arg4[%c51] : memref<72xf32, #tpu.memory_space<smem>>
    %300 = vector.broadcast %299 : f32 to vector<1x256xf32>
    %301 = arith.mulf %300, %286 : vector<1x256xf32>
    %302 = arith.addf %282, %301 : vector<1x256xf32>
    %c241_i32_44 = arith.constant 241 : i32
    %303 = tpu.dynamic_rotate %49 by %c241_i32_44 dim 1 : vector<1x256xf32>, i32 -> vector<1x256xf32>
    %cst_45 = arith.constant 0.000000e+00 : f32
    %304 = vector.broadcast %cst_45 : f32 to vector<1x256xf32>
    %305 = arith.select %283, %303, %304 : vector<1x256xi1>, vector<1x256xf32>
    %c52 = arith.constant 52 : index
    %306 = memref.load %arg4[%c52] : memref<72xf32, #tpu.memory_space<smem>>
    %307 = vector.broadcast %306 : f32 to vector<1x256xf32>
    %308 = arith.mulf %307, %305 : vector<1x256xf32>
    %309 = arith.addf %290, %308 : vector<1x256xf32>
    %c53 = arith.constant 53 : index
    %310 = memref.load %arg4[%c53] : memref<72xf32, #tpu.memory_space<smem>>
    %311 = vector.broadcast %310 : f32 to vector<1x256xf32>
    %312 = arith.mulf %311, %305 : vector<1x256xf32>
    %313 = arith.addf %294, %312 : vector<1x256xf32>
    %c54 = arith.constant 54 : index
    %314 = memref.load %arg4[%c54] : memref<72xf32, #tpu.memory_space<smem>>
    %315 = vector.broadcast %314 : f32 to vector<1x256xf32>
    %316 = arith.mulf %315, %305 : vector<1x256xf32>
    %317 = arith.addf %298, %316 : vector<1x256xf32>
    %c55 = arith.constant 55 : index
    %318 = memref.load %arg4[%c55] : memref<72xf32, #tpu.memory_space<smem>>
    %319 = vector.broadcast %318 : f32 to vector<1x256xf32>
    %320 = arith.mulf %319, %305 : vector<1x256xf32>
    %321 = arith.addf %302, %320 : vector<1x256xf32>
    %c240_i32 = arith.constant 240 : i32
    %322 = tpu.dynamic_rotate %43 by %c240_i32 dim 1 : vector<1x256xf32>, i32 -> vector<1x256xf32>
    %cst_46 = arith.constant 0.000000e+00 : f32
    %323 = vector.broadcast %cst_46 : f32 to vector<1x256xf32>
    %324 = arith.select %58, %322, %323 : vector<1x256xi1>, vector<1x256xf32>
    %c56 = arith.constant 56 : index
    %325 = memref.load %arg4[%c56] : memref<72xf32, #tpu.memory_space<smem>>
    %326 = vector.broadcast %325 : f32 to vector<1x256xf32>
    %327 = arith.mulf %326, %324 : vector<1x256xf32>
    %328 = arith.addf %309, %327 : vector<1x256xf32>
    %c57 = arith.constant 57 : index
    %329 = memref.load %arg4[%c57] : memref<72xf32, #tpu.memory_space<smem>>
    %330 = vector.broadcast %329 : f32 to vector<1x256xf32>
    %331 = arith.mulf %330, %324 : vector<1x256xf32>
    %332 = arith.addf %313, %331 : vector<1x256xf32>
    %c58 = arith.constant 58 : index
    %333 = memref.load %arg4[%c58] : memref<72xf32, #tpu.memory_space<smem>>
    %334 = vector.broadcast %333 : f32 to vector<1x256xf32>
    %335 = arith.mulf %334, %324 : vector<1x256xf32>
    %336 = arith.addf %317, %335 : vector<1x256xf32>
    %c59 = arith.constant 59 : index
    %337 = memref.load %arg4[%c59] : memref<72xf32, #tpu.memory_space<smem>>
    %338 = vector.broadcast %337 : f32 to vector<1x256xf32>
    %339 = arith.mulf %338, %324 : vector<1x256xf32>
    %340 = arith.addf %321, %339 : vector<1x256xf32>
    %c240_i32_47 = arith.constant 240 : i32
    %341 = tpu.dynamic_rotate %49 by %c240_i32_47 dim 1 : vector<1x256xf32>, i32 -> vector<1x256xf32>
    %cst_48 = arith.constant 0.000000e+00 : f32
    %342 = vector.broadcast %cst_48 : f32 to vector<1x256xf32>
    %343 = arith.select %58, %341, %342 : vector<1x256xi1>, vector<1x256xf32>
    %c60 = arith.constant 60 : index
    %344 = memref.load %arg4[%c60] : memref<72xf32, #tpu.memory_space<smem>>
    %345 = vector.broadcast %344 : f32 to vector<1x256xf32>
    %346 = arith.mulf %345, %343 : vector<1x256xf32>
    %347 = arith.addf %328, %346 : vector<1x256xf32>
    %c61 = arith.constant 61 : index
    %348 = memref.load %arg4[%c61] : memref<72xf32, #tpu.memory_space<smem>>
    %349 = vector.broadcast %348 : f32 to vector<1x256xf32>
    %350 = arith.mulf %349, %343 : vector<1x256xf32>
    %351 = arith.addf %332, %350 : vector<1x256xf32>
    %c62 = arith.constant 62 : index
    %352 = memref.load %arg4[%c62] : memref<72xf32, #tpu.memory_space<smem>>
    %353 = vector.broadcast %352 : f32 to vector<1x256xf32>
    %354 = arith.mulf %353, %343 : vector<1x256xf32>
    %355 = arith.addf %336, %354 : vector<1x256xf32>
    %c63 = arith.constant 63 : index
    %356 = memref.load %arg4[%c63] : memref<72xf32, #tpu.memory_space<smem>>
    %357 = vector.broadcast %356 : f32 to vector<1x256xf32>
    %358 = arith.mulf %357, %343 : vector<1x256xf32>
    %359 = arith.addf %340, %358 : vector<1x256xf32>
    %360 = arith.andi %58, %62 : vector<1x256xi1>
    %c239_i32 = arith.constant 239 : i32
    %361 = tpu.dynamic_rotate %43 by %c239_i32 dim 1 : vector<1x256xf32>, i32 -> vector<1x256xf32>
    %cst_49 = arith.constant 0.000000e+00 : f32
    %362 = vector.broadcast %cst_49 : f32 to vector<1x256xf32>
    %363 = arith.select %360, %361, %362 : vector<1x256xi1>, vector<1x256xf32>
    %c64 = arith.constant 64 : index
    %364 = memref.load %arg4[%c64] : memref<72xf32, #tpu.memory_space<smem>>
    %365 = vector.broadcast %364 : f32 to vector<1x256xf32>
    %366 = arith.mulf %365, %363 : vector<1x256xf32>
    %367 = arith.addf %347, %366 : vector<1x256xf32>
    %c65 = arith.constant 65 : index
    %368 = memref.load %arg4[%c65] : memref<72xf32, #tpu.memory_space<smem>>
    %369 = vector.broadcast %368 : f32 to vector<1x256xf32>
    %370 = arith.mulf %369, %363 : vector<1x256xf32>
    %371 = arith.addf %351, %370 : vector<1x256xf32>
    %c66 = arith.constant 66 : index
    %372 = memref.load %arg4[%c66] : memref<72xf32, #tpu.memory_space<smem>>
    %373 = vector.broadcast %372 : f32 to vector<1x256xf32>
    %374 = arith.mulf %373, %363 : vector<1x256xf32>
    %375 = arith.addf %355, %374 : vector<1x256xf32>
    %c67 = arith.constant 67 : index
    %376 = memref.load %arg4[%c67] : memref<72xf32, #tpu.memory_space<smem>>
    %377 = vector.broadcast %376 : f32 to vector<1x256xf32>
    %378 = arith.mulf %377, %363 : vector<1x256xf32>
    %379 = arith.addf %359, %378 : vector<1x256xf32>
    %c239_i32_50 = arith.constant 239 : i32
    %380 = tpu.dynamic_rotate %49 by %c239_i32_50 dim 1 : vector<1x256xf32>, i32 -> vector<1x256xf32>
    %cst_51 = arith.constant 0.000000e+00 : f32
    %381 = vector.broadcast %cst_51 : f32 to vector<1x256xf32>
    %382 = arith.select %360, %380, %381 : vector<1x256xi1>, vector<1x256xf32>
    %c68 = arith.constant 68 : index
    %383 = memref.load %arg4[%c68] : memref<72xf32, #tpu.memory_space<smem>>
    %384 = vector.broadcast %383 : f32 to vector<1x256xf32>
    %385 = arith.mulf %384, %382 : vector<1x256xf32>
    %386 = arith.addf %367, %385 : vector<1x256xf32>
    %c69 = arith.constant 69 : index
    %387 = memref.load %arg4[%c69] : memref<72xf32, #tpu.memory_space<smem>>
    %388 = vector.broadcast %387 : f32 to vector<1x256xf32>
    %389 = arith.mulf %388, %382 : vector<1x256xf32>
    %390 = arith.addf %371, %389 : vector<1x256xf32>
    %c70 = arith.constant 70 : index
    %391 = memref.load %arg4[%c70] : memref<72xf32, #tpu.memory_space<smem>>
    %392 = vector.broadcast %391 : f32 to vector<1x256xf32>
    %393 = arith.mulf %392, %382 : vector<1x256xf32>
    %394 = arith.addf %375, %393 : vector<1x256xf32>
    %c71 = arith.constant 71 : index
    %395 = memref.load %arg4[%c71] : memref<72xf32, #tpu.memory_space<smem>>
    %396 = vector.broadcast %395 : f32 to vector<1x256xf32>
    %397 = arith.mulf %396, %382 : vector<1x256xf32>
    %398 = arith.addf %379, %397 : vector<1x256xf32>
    %c0_52 = arith.constant 0 : index
    %399 = memref.load %arg5[%c0_52] : memref<4xf32, #tpu.memory_space<smem>>
    %400 = vector.broadcast %399 : f32 to vector<1x256xf32>
    %401 = arith.addf %386, %400 : vector<1x256xf32>
    %cst_53 = arith.constant 1.000000e-01 : f32
    %402 = vector.broadcast %cst_53 : f32 to vector<1x256xf32>
    %403 = arith.mulf %402, %401 : vector<1x256xf32>
    %404 = arith.maximumf %401, %403 : vector<1x256xf32>
    %c0_54 = arith.constant 0 : index
    %c0_55 = arith.constant 0 : index
    %c0_56 = arith.constant 0 : index
    %405 = vector.load %arg1[%c0_54, %c0_55, %c0_56] : memref<1x4x256xf32, #tpu.memory_space<vmem>>, vector<1x1x256xf32>
    %406 = vector.shape_cast %405 : vector<1x1x256xf32> to vector<1x256xf32>
    %407 = arith.addf %404, %406 : vector<1x256xf32>
    %c0_57 = arith.constant 0 : index
    %c0_58 = arith.constant 0 : index
    %c0_59 = arith.constant 0 : index
    %408 = vector.load %arg6[%c0_57, %c0_58, %c0_59] : memref<1x4x256xf32, #tpu.memory_space<vmem>>, vector<1x1x256xf32>
    %409 = vector.shape_cast %408 : vector<1x1x256xf32> to vector<1x256xf32>
    %410 = vector.shape_cast %407 : vector<1x256xf32> to vector<1x1x256xf32>
    tpu.vector_store %arg6[%c0_57, %c0_58, %c0_59], %410 {strides = array<i32>} : memref<1x4x256xf32, #tpu.memory_space<vmem>>, vector<1x1x256xf32>,
    %c1_60 = arith.constant 1 : index
    %411 = memref.load %arg5[%c1_60] : memref<4xf32, #tpu.memory_space<smem>>
    %412 = vector.broadcast %411 : f32 to vector<1x256xf32>
    %413 = arith.addf %390, %412 : vector<1x256xf32>
    %cst_61 = arith.constant 1.000000e-01 : f32
    %414 = vector.broadcast %cst_61 : f32 to vector<1x256xf32>
    %415 = arith.mulf %414, %413 : vector<1x256xf32>
    %416 = arith.maximumf %413, %415 : vector<1x256xf32>
    %c0_62 = arith.constant 0 : index
    %c1_63 = arith.constant 1 : index
    %c0_64 = arith.constant 0 : index
    %417 = vector.load %arg1[%c0_62, %c1_63, %c0_64] : memref<1x4x256xf32, #tpu.memory_space<vmem>>, vector<1x1x256xf32>
    %418 = vector.shape_cast %417 : vector<1x1x256xf32> to vector<1x256xf32>
    %419 = arith.addf %416, %418 : vector<1x256xf32>
    %c0_65 = arith.constant 0 : index
    %c1_66 = arith.constant 1 : index
    %c0_67 = arith.constant 0 : index
    %420 = vector.load %arg6[%c0_65, %c1_66, %c0_67] : memref<1x4x256xf32, #tpu.memory_space<vmem>>, vector<1x1x256xf32>
    %421 = vector.shape_cast %420 : vector<1x1x256xf32> to vector<1x256xf32>
    %422 = vector.shape_cast %419 : vector<1x256xf32> to vector<1x1x256xf32>
    tpu.vector_store %arg6[%c0_65, %c1_66, %c0_67], %422 {strides = array<i32>} : memref<1x4x256xf32, #tpu.memory_space<vmem>>, vector<1x1x256xf32>,
    %c2_68 = arith.constant 2 : index
    %423 = memref.load %arg5[%c2_68] : memref<4xf32, #tpu.memory_space<smem>>
    %424 = vector.broadcast %423 : f32 to vector<1x256xf32>
    %425 = arith.addf %394, %424 : vector<1x256xf32>
    %cst_69 = arith.constant 1.000000e-01 : f32
    %426 = vector.broadcast %cst_69 : f32 to vector<1x256xf32>
    %427 = arith.mulf %426, %425 : vector<1x256xf32>
    %428 = arith.maximumf %425, %427 : vector<1x256xf32>
    %c0_70 = arith.constant 0 : index
    %c2_71 = arith.constant 2 : index
    %c0_72 = arith.constant 0 : index
    %429 = vector.load %arg1[%c0_70, %c2_71, %c0_72] : memref<1x4x256xf32, #tpu.memory_space<vmem>>, vector<1x1x256xf32>
    %430 = vector.shape_cast %429 : vector<1x1x256xf32> to vector<1x256xf32>
    %431 = arith.addf %428, %430 : vector<1x256xf32>
    %c0_73 = arith.constant 0 : index
    %c2_74 = arith.constant 2 : index
    %c0_75 = arith.constant 0 : index
    %432 = vector.load %arg6[%c0_73, %c2_74, %c0_75] : memref<1x4x256xf32, #tpu.memory_space<vmem>>, vector<1x1x256xf32>
    %433 = vector.shape_cast %432 : vector<1x1x256xf32> to vector<1x256xf32>
    %434 = vector.shape_cast %431 : vector<1x256xf32> to vector<1x1x256xf32>
    tpu.vector_store %arg6[%c0_73, %c2_74, %c0_75], %434 {strides = array<i32>} : memref<1x4x256xf32, #tpu.memory_space<vmem>>, vector<1x1x256xf32>,
    %c3_76 = arith.constant 3 : index
    %435 = memref.load %arg5[%c3_76] : memref<4xf32, #tpu.memory_space<smem>>
    %436 = vector.broadcast %435 : f32 to vector<1x256xf32>
    %437 = arith.addf %398, %436 : vector<1x256xf32>
    %cst_77 = arith.constant 1.000000e-01 : f32
    %438 = vector.broadcast %cst_77 : f32 to vector<1x256xf32>
    %439 = arith.mulf %438, %437 : vector<1x256xf32>
    %440 = arith.maximumf %437, %439 : vector<1x256xf32>
    %c0_78 = arith.constant 0 : index
    %c3_79 = arith.constant 3 : index
    %c0_80 = arith.constant 0 : index
    %441 = vector.load %arg1[%c0_78, %c3_79, %c0_80] : memref<1x4x256xf32, #tpu.memory_space<vmem>>, vector<1x1x256xf32>
    %442 = vector.shape_cast %441 : vector<1x1x256xf32> to vector<1x256xf32>
    %443 = arith.addf %440, %442 : vector<1x256xf32>
    %c0_81 = arith.constant 0 : index
    %c3_82 = arith.constant 3 : index
    %c0_83 = arith.constant 0 : index
    %444 = vector.load %arg6[%c0_81, %c3_82, %c0_83] : memref<1x4x256xf32, #tpu.memory_space<vmem>>, vector<1x1x256xf32>
    %445 = vector.shape_cast %444 : vector<1x1x256xf32> to vector<1x256xf32>
    %446 = vector.shape_cast %443 : vector<1x256xf32> to vector<1x1x256xf32>
    tpu.vector_store %arg6[%c0_81, %c3_82, %c0_83], %446 {strides = array<i32>} : memref<1x4x256xf32, #tpu.memory_space<vmem>>, vector<1x1x256xf32>,
    return
  }
  func.func @transform_0(%arg0: i32) -> (i32, i32, i32) {
    %c0_i32 = arith.constant 0 : i32
    %c0_i32_0 = arith.constant 0 : i32
    %c0_i32_1 = arith.constant 0 : i32
    return %arg0, %c0_i32, %c0_i32_0 : i32, i32, i32
  }
  func.func @transform_1(%arg0: i32) -> i32 {
    %c0_i32 = arith.constant 0 : i32
    %c0_i32_0 = arith.constant 0 : i32
    return %c0_i32 : i32
  }
  func.func @transform_2(%arg0: i32) -> i32 {
    %c0_i32 = arith.constant 0 : i32
    %c0_i32_0 = arith.constant 0 : i32
    return %c0_i32 : i32
  }
  func.func @transform_3(%arg0: i32) -> i32 {
    %c0_i32 = arith.constant 0 : i32
    %c0_i32_0 = arith.constant 0 : i32
    return %c0_i32 : i32
  }
  func.func @transform_4(%arg0: i32) -> i32 {
    %c0_i32 = arith.constant 0 : i32
    %c0_i32_0 = arith.constant 0 : i32
    return %c0_i32 : i32
  }
  func.func @transform_5(%arg0: i32) -> (i32, i32, i32) {
    %c0_i32 = arith.constant 0 : i32
    %c0_i32_0 = arith.constant 0 : i32
    %c0_i32_1 = arith.constant 0 : i32
    return %arg0, %c0_i32, %c0_i32_0 : i32, i32, i32
  }
}

</mosaic_0001>

<bundles_post_ra>
// kernel: tpu_custom_call.1
= control target key start
LH: loop header
LB: loop body
LE: loop exit
PB: predicated region body
PF: predicated region fallthrough
CT: control target
= control target key end

     0   :  { %s2520_s0 = inlined_call_operand.hbm [shape: f32[2,4,256], index: 0, kind: input, shape index: {}]   ;;  %s2521_s1 = inlined_call_operand.hbm [shape: f32[8], index: 1, kind: input, shape index: {}]   ;;  %s2522_s2 = inlined_call_operand.vmem [shape: f32[2], index: 2, kind: input, shape index: {}]   ;;  %s2523_s3 = inlined_call_operand.vmem [shape: f32[72], index: 3, kind: input, shape index: {}]   ;;  %s2524_s4 = inlined_call_operand.vmem [shape: f32[4], index: 4, kind: input, shape index: {}]   ;;  %s2525_s5 = inlined_call_operand.hbm [shape: f32[2,4,256], index: 5, kind: output, shape index: {}]  }
   0x1   :  { %2537 = sst [smem:[#allocation25_spill]] %s2520_s0 }
   0x2   :  { %2538 = sst [smem:[#allocation26_spill]] %s2521_s1 }
   0x3   :  { %2539 = sst [smem:[#allocation27_spill]] %s2522_s2 }
   0x4   :  { %2540 = sst [smem:[#allocation28_spill]] %s2523_s3 }
   0x5   :  { %2541 = sst [smem:[#allocation29_spill]] %s2524_s4 }
   0x6   :  { %10 = vsyncpa [#allocation3], 0 }
   0x7   :  { %12 = vsyncpa [#allocation3 + $0x1], 0 }
   0x8   :  { %13 = vsyncpa [#allocation5], 0 }
   0x9   :  { %14 = vsyncpa [#allocation6], 0 }
   0xa   :  { %15 = vsyncpa [#allocation10], 0 }
   0xb   :  { %16 = vsyncpa [#allocation4], 0 }
   0xc   :  { %18 = vsyncpa [#allocation4 + $0x1], 0  ;;  %s1615_s18 = smov 0   ;;  %s1617_s19 = smov 0  }
   0xd   :  { %s1619_s20 = smov 0   ;;  %s1621_s21 = smov 0  }
   0xe LB: > { %2542 = sst [smem:[#allocation18_spill]] %s1559_s18  ;;  %s1639_s25 = sadd.s32 4294967295, %s1571_s21   ;;  %s1571_s21 = sphi %s1621_s21, %s2590_s21   ;;  %s1567_s20 = sphi %s1619_s20, %s2593_s20   ;;  %s1563_s19 = sphi %s1617_s19, %s2592_s19   ;;  %s1559_s18 = sphi %s1615_s18, %s2591_s18  }
   0xf   : > { %2543 = sst [smem:[#allocation19_spill]] %s1563_s19  ;;  %p1193_p0 = scmp.ge.s32.totalorder %s1571_s21, 1 }
  0x10   : > { %2544 = sst [smem:[#allocation20_spill]] %s1567_s20  ;;  %p45_p1 = scmp.eq.s32.totalorder %s1639_s25, 0 }
  0x11   : > { %2545 = sst [smem:[#allocation21_spill]] %s1571_s21  ;;  %p165_p2 = scmp.lt.s32.totalorder %s1571_s21, 3 }
  0x12   : > { %s2546_s3 = sld [smem:[#allocation28_spill]]  ;;  %s1573_s11 = smov [#allocation9]  }
  0x13   : > { %p1644_p3 = pnand %p1193_p0, %p165_p2  ;;  %s2548_s1 = sld [smem:[#allocation26_spill]] }
  0x14   : > { %s2549_s2 = sld [smem:[#allocation27_spill]]  ;;  %s1574_s12 = smov [#allocation7]  }
  0x15   : > { %p1327_p5 = pneg %p1644_p3  ;;  %s2550_s4 = sld [smem:[#allocation29_spill]] }
  0x16   : > { %s1575_s13 = smov [#allocation8]   ;;  %s1576_s14 = smov [#allocation11]  }
  0x17   : > { %p1328_p6 = pnand %p1327_p5, %p45_p1  ;;  %s1192_s15 = sadd.s32 4294967294, %s1571_s21  }
  0x18   : > { %s197_s24 = sshll.u32 %s2546_s3, 4  ;;  %s1664_s16 = sadd.s32 1, %s1571_s21   ;;  %s198_s24 = int_to_ptr.vmem [resolvable:$true] %s197_s24 }
  0x19   : > { %s177_s29 = sshll.u32 %s2548_s1, 4  ;;  %2551 = sst [smem:[#allocation22_spill]] %s1664_s16  ;;  %s178_s29 = int_to_ptr.hbm [resolvable:$true] %s177_s29 }
  0x1a   : > { %s187_s7 = sshll.u32 %s2549_s2, 4  ;;  %s28_s17 = ssub.s32 %s1571_s21, %s1664_s16  ;;  %s188_s7 = int_to_ptr.vmem [resolvable:$true] %s187_s7 }
  0x1b   : > { %s207_s10 = sshll.u32 %s2550_s4, 4  ;;  %s31_s22 = sadd.s32 1, %s1567_s20  ;;  %s208_s10 = int_to_ptr.vmem [resolvable:$true] %s207_s10 }
  0x1c   : > { %1336 = dma.vmem_to_smem (!%p1328_p6), %s198_s24, 16, %s1573_s11, [#allocation10]  }
  0x1d   : > { %1330 = dma.hbm_to_smem (!%p1328_p6), %s178_s29, 16, %s1574_s12, [#allocation5]  }
  0x1e   : > { %1333 = dma.vmem_to_smem (!%p1328_p6), %s188_s7, 16, %s1575_s13, [#allocation6]  }
  0x1f   : > { %1339 = dma.vmem_to_smem (!%p1328_p6), %s208_s10, 16, %s1576_s14, [#allocation10]  }
  0x20   : > { %p29_p7 = scmp.eq.s32.totalorder %s28_s17, 0  ;;  %p38_p8 = scmp.ne.s32.totalorder %s1567_s20, %s1563_s19 }
  0x21   : > { %p39_p9 = scmp.eq.s32.totalorder %s1571_s21, 0  ;;  %p44_p10 = scmp.ne.s32.totalorder %s1563_s19, %s1559_s18 }
  0x22   : > { %s1675_s23 = scalar_select %p29_p7, %s1567_s20, %s31_s22  }
  0x23   : > { %p1677_p11 = por %p39_p9, %p38_p8  ;;  %p1683_p12 = por %p45_p1, %p44_p10 }
  0x24   : > { %2552 = sst [smem:[#allocation23_spill]] %s1675_s23  ;;  %p152_p13 = scmp.eq.s32.totalorder %s1639_s25, 1 }
  0x25   : > { %p158_p0 = scmp.eq.s32.totalorder %s1192_s15, 1  ;;  %p1352_p2 = scmp.lt.s32.totalorder %s1571_s21, 2 }
  0x26   : > { %s218_s28 = sand.u32 1, %s1567_s20   ;;  %p1690_p5 = por %p152_p13, %p38_p8 }
  0x27   : > { %p1694_p6 = por %p158_p0, %p44_p10  ;;  %s1199_s6 = sshll.u32 %s218_s28, 3 }
  0x28   : > { %s1305_s7 = sshll.u32 %s1571_s21, 3  ;;  %s2558_s0 = sld [smem:[#allocation25_spill]] }
  0x29   : > { %s2556_s30 = scalar_select %p1694_p6, 1, 0 }
  0x2a   : > { %s222_s11 = scalar_lea.vmem [#allocation2], %s1199_s6  ;;  %p1704_p7 = pnand %p1352_p2, %p1677_p11 }
  0x2b   : > { %2557 = sst [smem:[#allocation24_spill]] %s2556_s30  ;;  %s231_s12 = sshll.u32 %s222_s11, 4  ;;  %s232_s12 = int_to_ptr.vmem [resolvable:$true] %s231_s12 }
  0x2c   : > { %s219_s15 = scalar_lea.sflag [#allocation3], %s218_s28  ;;  %p1467_p9 = pneg %p1704_p7 }
  0x2e   : > { %s227_s10 = scalar_lea.hbm %s2558_s0, %s1305_s7  ;;  %s1470_s8 = scalar_lea.hbm %s2558_s0, 16 }
  0x2f   : > { %s229_s13 = sshll.u32 %s227_s10, 4  ;;  %s230_s13 = int_to_ptr.hbm [resolvable:$true] %s229_s13 }
  0x30   : > { %s1463_s17 = sshra.s32 %s230_s13, 4  ;;  %s1464_s17 = int_to_ptr.hbm [resolvable:$true] %s1463_s17 }
  0x31   : > { %s1465_s22 = scalar_lea.hbm %s1464_s17, 8  ;;  %p1471_p11 = scmp.lt.s32.totalorder %s1464_s17, %s2558_s0 }
  0x32   : > { %p1466_p8 = scmp.ne.s32.totalorder %s1464_s17, %s1465_s22  ;;  %p1472_p0 = scmp.lt.s32.totalorder %s1470_s8, %s1465_s22 }
  0x34   : > { %p1468_p10 = pnand %p1467_p9, %p1466_p8  ;;  %p1473_p2 = por %p1472_p0, %p1471_p11 }
  0x36   : > { %p1469_p13 = pneg %p1468_p10 }
  0x38   : > { %p1474_p4 = pnand %p1473_p2, %p1469_p13 }
  0x3a   : > { %1477 = shalt.err (!%p1474_p4)
}
  0x3b   : > { %1343 = dma.hbm_to_vmem [thread:$0]  (!%p1704_p7), %s230_s13, 128, %s232_s12, %s219_s15  }
  0x3c   : > { %240 = sbr.rel (%p1644_p3) target bundleno = 342 (0x156), region = 40  ;;  %s1721_s28 = sand.u32 (!%p1644_p3), 1, %s1563_s19  }
  0x3d   : > { %s2526_s10 = sshll.u32 (!%p1644_p3), %s1721_s28, 3  ;;  %s243_s11 = scalar_lea.sflag (!%p1644_p3), [#allocation3], %s1721_s28 }
  0x3e   : > { %s1727_s17 = scalar_lea.vmem (!%p1644_p3), [#allocation2], %s2526_s10 }
  0x41   : > { %1538 = dma.done.wait (%p1683_p12), %s243_s11, 128  }
  0x42   : > { %1540 = vsyncadd (%p1683_p12), %s243_s11, 4294967168 }
  0x43   : > { %1542 = dma.done.wait (%p45_p1), [#allocation5], 16  }
  0x44   : > { %1544 = vsyncadd (%p45_p1), [#allocation5], 4294967280 }
  0x45   : > { %1546 = dma.done.wait (%p45_p1), [#allocation6], 16  }
  0x46   : > { %1548 = vsyncadd (%p45_p1), [#allocation6], 4294967280 }
  0x47   : > { %1550 = dma.done.wait (%p45_p1), [#allocation10], 32  }
  0x48   : > { %1552 = vsyncadd (%p45_p1), [#allocation10], 4294967264 }
  0x49   : > { %272 = sfence }
  0x4a   : > { %s1209_s26 = sld [smem:[#allocation7 + $0x1]]  ;;  %v295_v0 = vld [vmem:[%s1727_s17] ss:$4 sm:$0x3]  ;;  %s1577_s9 = smov 17   ;;  %v2534_v38 = vlaneseq }
  0x4b   : > { %s1212_s27 = sld [smem:[#allocation7 + $0x3]]  ;;  %v1210_v1 = vld [vmem:[%s1727_s17 + $0x1] ss:$4 sm:$0x3]  ;;  %s1578_s24 = smov 16  }
  0x4c   : > { %s1215_s12 = sld [smem:[#allocation7 + $0x5]]  ;;  %v1213_v3 = vld [vmem:[%s1727_s17 + $0x2] ss:$4 sm:$0x3]  ;;  %s1579_s11 = smov 15   ;;  %v1782_v40 = vand.u32 127, %v2534_v38 }
  0x4d   : > { %s1218_s13 = sld [smem:[#allocation7 + $0x7]]  ;;  %v1216_v6 = vld [vmem:[%s1727_s17 + $0x3] ss:$4 sm:$0x3] }
  0x4e   : > { %s1219_s14 = sld [smem:[#allocation8 + $0x1]]  ;;  %v1793_v41 = vadd.s32 128, %v1782_v40  ;;  %v2536_v42 = vshra.s32 %v1782_v40, 4  ;;  %vm430_vm0 = vcmp.lt.s32.totalorder %v1782_v40, 16  ;;  %v347_v45 = vand.u32 15, %v1782_v40 }
  0x4f   : > { %s296_s15 = sld [smem:[#allocation7]]  ;;  %vm368_vm5 = vcmp.lt.s32.totalorder %v1782_v40, 17  ;;  %vm497_vm10 = vcmp.lt.s32.totalorder %v1782_v40, 15  ;;  %vm562_vm13 = vcmp.lt.s32.totalorder %v1782_v40, 1  ;;  %vm707_vm14 = vcmp.lt.s32.totalorder %v1782_v40, 127 }
  0x50   : > { %v300_v2 = vstv %s1209_s26  ;;  %s1211_s22 = sld [smem:[#allocation7 + $0x2]]  ;;  %s1580_s26 = smov 1   ;;  %v2535_v43 = vshra.s32 %v1793_v41, 4  ;;  %vm1815_vm1 = vcmp.ge.s32.totalorder %v2536_v42, 1  ;;  %v348_v49 = vand.u32 15, %v1793_v41 }
  0x51   : > { %v301_v4 = vmul.f32 %v300_v2, %v295_v0  ;;  %v309_v5 = vstv %s1212_s27  ;;  %s1214_s6 = sld [smem:[#allocation7 + $0x4]]  ;;  %s1581_s27 = smov 127   ;;  %vm1846_vm3 = vcmp.ge.s32.totalorder %v347_v45, 1  ;;  %vm1939_vm8 = vcmp.lt.s32.totalorder %v347_v45, 15 }
  0x52   : > { %v310_v7 = vmul.f32 %v1210_v1, %v309_v5  ;;  %v319_v8 = vstv %s1215_s12  ;;  %s1217_s7 = sld [smem:[#allocation7 + $0x6]]  ;;  %s1582_s12 = smov 113   ;;  %vm1826_vm2 = vcmp.ge.s32.totalorder %v2535_v43, 1  ;;  %vm1858_vm4 = vcmp.ge.s32.totalorder %v348_v49, 1  ;;  %vm357_vm6 = vmand %vm1815_vm1, %vm1846_vm3 }
  0x53   : > { %v320_v9 = vmul.f32 %v1213_v3, %v319_v8  ;;  %v329_v10 = vstv %s1218_s13  ;;  %s332_s8 = sld [smem:[#allocation8]]  ;;  %s1583_s13 = smov 112   ;;  %vm358_vm7 = vmand %vm1826_vm2, %vm1858_vm4  ;;  %vm1955_vm9 = vcmp.lt.s32.totalorder %v348_v49, 15 }
  0x54   : > { %v311_v11 = vadd.f32 %v310_v7, %v301_v4  ;;  %v330_v12 = vmul.f32 %v1216_v6, %v329_v10  ;;  %v338_v17 = vstv %s1219_s14  ;;  %s1584_s14 = smov 111   ;;  %s1786_s10 = sld [smem:[#allocation9 + $0xd]]  ;;  %vm491_vm11 = vmand %vm1815_vm1, %vm1939_vm8 }
  0x55   : > { %v297_v13 = vstv %s296_s15  ;;  %s1757_s15 = sld [smem:[#allocation9 + $0x8]]  ;;  %vm492_vm12 = vmand %vm1826_vm2, %vm1955_vm9 }
  0x56   : > { %v321_v14 = vadd.f32 %v320_v9, %v311_v11  ;;  %v298_v15 = vmul.f32 %v297_v13, %v295_v0  ;;  %v305_v16 = vstv %s1211_s22  ;;  %s1759_s22 = sld [smem:[#allocation9 + $0x9]] }
  0x57   : > { %v306_v18 = vmul.f32 %v1210_v1, %v305_v16  ;;  %v315_v19 = vstv %s1214_s6  ;;  %s1761_s6 = sld [smem:[#allocation9 + $0xa]] }
  0x58   : > { %v331_v20 = vadd.f32 %v330_v12, %v321_v14  ;;  %v316_v21 = vmul.f32 %v1213_v3, %v315_v19  ;;  %v325_v22 = vstv %s1217_s7  ;;  %s1763_s7 = sld [smem:[#allocation9 + $0xb]] }
  0x59   : > { %v307_v23 = vadd.f32 %v306_v18, %v298_v15  ;;  %v326_v24 = vmul.f32 %v1216_v6, %v325_v22  ;;  %v333_v28 = vstv %s332_s8  ;;  %s1765_s8 = sld [smem:[#allocation9 + $0x4]] }
  0x5a   : > { %v339_v25 = vadd.f32 %v338_v17, %v331_v20  ;;  %s1788_s0 = sld [smem:[#allocation9 + $0xe]]  ;;  %v474_v7 = vstv %s1786_s10 }
  0x5b   : > { %v317_v26 = vadd.f32 %v316_v21, %v307_v23  ;;  %s1790_s1 = sld [smem:[#allocation9 + $0xf]]  ;;  %v436_v51 = vstv %s1757_s15 }
  0x5c   : > { %v340_v27 = vmul.f32 0.1, %v339_v25  ;;  %s1795_s2 = sld [smem:[#allocation9 + $0x14]]  ;;  %v442_v52 = vstv %s1759_s22 }
  0x5d   : > { %v327_v29 = vadd.f32 %v326_v24, %v317_v26  ;;  %s1797_s3 = sld [smem:[#allocation9 + $0x15]]  ;;  %v448_v54 = vstv %s1761_s6 }
  0x5e   : > { %v1749_v30 = vmax.f32 %v339_v25, %v340_v27  ;;  %s1799_s4 = sld [smem:[#allocation9 + $0x16]]  ;;  %v454_v55 = vstv %s1763_s7 }
  0x5f   : > { %v334_v31 = vadd.f32 %v333_v28, %v327_v29  ;;  %s1802_s23 = sld [smem:[#allocation9 + $0x17]]  ;;  %v403_v56 = vstv %s1765_s8 }
  0x60   : > { %v390_v32 = vperm.slane %v1749_v30, 0  ;;  %v391_v36 = vperm.slane %v1749_v30, 1  ;;  %s1806_s20 = sld [smem:[#allocation9 + $0x10]]  ;;  %v480_v8 = vstv %s1788_s0 }
  0x61   : > { %v335_v33 = vmul.f32 0.1, %v334_v31  ;;  %s1808_s19 = sld [smem:[#allocation9 + $0x11]]  ;;  %v486_v9 = vstv %s1790_s1 }
  0x62   : > { %394 = vrot.lane.b32.xlu1 %v390_v32, %s1577_s9  ;;  %s1811_s16 = sld [smem:[#allocation9 + $0x12]]  ;;  %v535_v19 = vstv %s1795_s2 }
  0x63   : > { %v1752_v34 = vmax.f32 %v334_v31, %v335_v33  ;;  %s1822_s21 = sld [smem:[#allocation9 + $0x13]]  ;;  %v541_v22 = vstv %s1797_s3 }
  0x64   : > { %s1834_s30 = sld [smem:[#allocation9 + $0x18]]  ;;  %v547_v23 = vstv %s1799_s4 }
  0x65   : > { %v360_v35 = vperm.slane %v1752_v34, 0  ;;  %v361_v37 = vperm.slane %v1752_v34, 1  ;;  %s1840_s18 = sld [smem:[#allocation9 + $0x19]]  ;;  %v553_v26 = vstv %s1802_s23 }
  0x66   : > { %s1852_s15 = sld [smem:[#allocation9 + $0x1a]]  ;;  %v503_v27 = vstv %s1806_s20 }
  0x67   : > { %364 = vrot.lane.b32.xlu0 %v360_v35, %s1577_s9  ;;  %426 = vrot.lane.b32.xlu2 %v360_v35, %s1578_s24  ;;  %s1864_s22 = sld [smem:[#allocation9 + $0x1b]]  ;;  %v509_v28 = vstv %s1808_s19 }
  0x68   : > { %s1891_s6 = sld [smem:[#allocation9 + $0x28]]  ;;  %v515_v29 = vstv %s1811_s16 }
  0x69   : > { %s1920_s7 = sld [smem:[#allocation9 + $0x29]]  ;;  %v521_v31 = vstv %s1822_s21 }
  0x6a   : > { %396 = vrot.lane.b32.xlu1 %v391_v36, %s1577_s9  ;;  %s1926_s8 = sld [smem:[#allocation9 + $0x2a]] }
  0x6b   : > { %s2060_s0 = sld [smem:[#allocation9 + $0x22]] }
  0x6c   : > { %s2072_s1 = sld [smem:[#allocation9 + $0x23]] }
  0x6d   : > { %s2120_s2 = sld [smem:[#allocation9 + $0x24]] }
  0x6e   : > { %s2130_s3 = sld [smem:[#allocation9 + $0x25]] }
  0x6f   : > { %366 = vrot.lane.b32.xlu0 %v361_v37, %s1577_s9  ;;  %428 = vrot.lane.b32.xlu2 %v361_v37, %s1578_s24  ;;  %s1767_s9 = sld [smem:[#allocation9 + $0x5]] }
  0x70   : > { %s2173_s4 = sld [smem:[#allocation9 + $0x26]] }
  0x71   : > { %s2191_s19 = sld [smem:[#allocation9 + $0x2c]] }
  0x72   : > { %461 = vrot.lane.b32.xlu1 %v391_v36, %s1578_s24  ;;  %s2201_s20 = sld [smem:[#allocation9 + $0x2d]] }
  0x73   : > { %s2211_s21 = sld [smem:[#allocation9 + $0x2e]] }
  0x74   : > { %s2213_s16 = sld [smem:[#allocation9 + $0x2f]] }
  0x75   : > { %v409_v57 = vstv %s1767_s9  ;;  %s1931_s9 = sld [smem:[#allocation9 + $0x2b]] }
  0x76   : > { %s2237_s23 = sld [smem:[#allocation9 + $0x34]] }
  0x77   : > { %459 = vrot.lane.b32.xlu0 %v390_v32, %s1578_s24  ;;  %493 = vrot.lane.b32.xlu2 %v360_v35, %s1579_s11  ;;  %s1769_s24 = sld [smem:[#allocation9 + $0x6]] }
  0x78   : > { %s2245_s10 = sld [smem:[#allocation9 + $0x36]] }
  0x7a   : > { %526 = vrot.lane.b32.xlu1 %v390_v32, %s1579_s11 }
  0x7d   : > { %v415_v60 = vstv %s1769_s24  ;;  %s1960_s24 = sld [smem:[#allocation9 + $0x1c]] }
  0x7f   : > { %495 = vrot.lane.b32.xlu0 %v361_v37, %s1579_s11  ;;  %528 = vrot.lane.b32.xlu2 %v391_v36, %s1579_s11  ;;  %s1771_s11 = sld [smem:[#allocation9 + $0x7]] }
  0x82   : > { %560 = vrot.lane.b32.xlu1 %v361_v37, %s1580_s26 }
  0x85   : > { %v421_v61 = vstv %s1771_s11  ;;  %s1962_s11 = sld [smem:[#allocation9 + $0x1d]] }
  0x87   : > { %558 = vrot.lane.b32.xlu0 %v360_v35, %s1580_s26  ;;  %591 = vrot.lane.b32.xlu2 %v390_v32, %s1580_s26 }
  0x8a   : > { %703 = vrot.lane.b32.xlu1 %v360_v35, %s1581_s27 }
  0x8f   : > { %593 = vrot.lane.b32.xlu0 %v391_v36, %s1580_s26  ;;  %705 = vrot.lane.b32.xlu2 %v361_v37, %s1581_s27  ;;  %s1773_s26 = sld [smem:[#allocation9]] }
  0x92   : > { %738 = vrot.lane.b32.xlu1 %v391_v36, %s1581_s27 }
  0x95   : > { %v374_v0 = vstv %s1773_s26  ;;  %s1969_s26 = sld [smem:[#allocation9 + $0x1e]] }
  0x97   : > { %736 = vrot.lane.b32.xlu0 %v390_v32, %s1581_s27  ;;  %770 = vrot.lane.b32.xlu2 %v360_v35, %s1582_s12  ;;  %s1775_s27 = sld [smem:[#allocation9 + $0x1]] }
  0x9a   : > { %803 = vrot.lane.b32.xlu1 %v390_v32, %s1582_s12 }
  0x9d   : > { %v378_v2 = vstv %s1775_s27  ;;  %s1971_s27 = sld [smem:[#allocation9 + $0x1f]] }
  0x9f   : > { %772 = vrot.lane.b32.xlu0 %v361_v37, %s1582_s12  ;;  %805 = vrot.lane.b32.xlu2 %v391_v36, %s1582_s12  ;;  %s1777_s12 = sld [smem:[#allocation9 + $0x2]] }
  0xa2   : > { %837 = vrot.lane.b32.xlu1 %v361_v37, %s1583_s13 }
  0xa5   : > { %v382_v3 = vstv %s1777_s12  ;;  %s1973_s12 = sld [smem:[#allocation9 + $0x20]] }
  0xa7   : > { %835 = vrot.lane.b32.xlu0 %v360_v35, %s1583_s13  ;;  %868 = vrot.lane.b32.xlu2 %v390_v32, %s1583_s13 }
  0xaa   : > { %902 = vrot.lane.b32.xlu1 %v360_v35, %s1584_s14  ;;  %v574_v35 = vstv %s1840_s18  ;;  %s2183_s18 = sld [smem:[#allocation9 + $0x27]] }
  0xaf   : > { %870 = vrot.lane.b32.xlu0 %v391_v36, %s1583_s13  ;;  %904 = vrot.lane.b32.xlu2 %v361_v37, %s1584_s14  ;;  %s1779_s13 = sld [smem:[#allocation9 + $0x3]]  ;;  %v731_v37 = vstv %s1931_s9 }
  0xb0   : > { %s2314_s9 = sld [smem:[#allocation9 + $0x39]] }
  0xb2   : > { %937 = vrot.lane.b32.xlu1 %v391_v36, %s1584_s14  ;;  %v580_v36 = vstv %s1852_s15  ;;  %s2256_s15 = sld [smem:[#allocation9 + $0x30]] }
  0xb5   : > { %v386_v4 = vstv %s1779_s13  ;;  %s1979_s13 = sld [smem:[#allocation9 + $0x21]] }
  0xb7   : > { %935 = vrot.lane.b32.xlu0 %v390_v32, %s1584_s14  ;;  %s1784_s14 = sld [smem:[#allocation9 + $0xc]]  ;;  %v568_v32 = vstv %s1834_s30 }
  0xb8   : > { %s2243_s30 = sld [smem:[#allocation9 + $0x35]] }
  0xbd   : > { %v468_v5 = vstv %s1784_s14  ;;  %s2253_s14 = sld [smem:[#allocation9 + $0x37]] }
  0xc1   : > { %v427_v39 = vpop.permute.xlu2 %426 }
  0xc9   : > { %v429_v44 = vpop.permute.xlu2 %428 }
  0xca   : > { %v432_v48 = vsel %vm430_vm0, %v429_v44, %v427_v39  ;;  %v431_v53 = vsel %vm430_vm0, %v427_v39, %v429_v44 }
  0xcb   : > { %v433_v58 = vsel %vm1815_vm1, %v432_v48, 0.0  ;;  %v434_v62 = vsel %vm1826_vm2, %v431_v53, 0.0 }
  0xcc   : > { %v1870_v6 = vmul.f32 %v436_v51, %v433_v58  ;;  %v1879_v10 = vmul.f32 %v436_v51, %v434_v62  ;;  %v1881_v11 = vmul.f32 %v442_v52, %v433_v58  ;;  %v1883_v12 = vmul.f32 %v442_v52, %v434_v62 }
  0xcd   : > { %v1885_v13 = vmul.f32 %v448_v54, %v433_v58  ;;  %v1893_v14 = vmul.f32 %v448_v54, %v434_v62  ;;  %v1895_v15 = vmul.f32 %v454_v55, %v433_v58  ;;  %v1897_v16 = vmul.f32 %v454_v55, %v434_v62 }
  0xce   : > { %v725_v62 = vstv %s1926_s8  ;;  %s2311_s8 = sld [smem:[#allocation9 + $0x38]] }
  0xd1   : > { %v1899_v18 = vpop.permute.xlu2 %493 }
  0xd4   : > { %v395_v46 = vpop.permute.xlu1 %394 }
  0xd9   : > { %v365_v1 = vpop.permute.xlu0 %364  ;;  %v529_v38 = vpop.permute.xlu2 %528 }
  0xdc   : > { %v397_v17 = vpop.permute.xlu1 %396 }
  0xdd   : > { %v398_v20 = vsel %vm368_vm5, %v395_v46, %v397_v17  ;;  %v399_v21 = vsel %vm368_vm5, %v397_v17, %v395_v46 }
  0xde   : > { %v400_v24 = vsel %vm357_vm6, %v399_v21, 0.0  ;;  %v401_v25 = vsel %vm358_vm7, %v398_v20, 0.0 }
  0xdf   : > { %v404_v33 = vmul.f32 %v403_v56, %v400_v24  ;;  %v405_v39 = vmul.f32 %v403_v56, %v401_v25  ;;  %v410_v44 = vmul.f32 %v409_v57, %v400_v24  ;;  %v411_v46 = vmul.f32 %v409_v57, %v401_v25 }
  0xe0   : > { %v416_v48 = vmul.f32 %v415_v60, %v400_v24  ;;  %v417_v52 = vmul.f32 %v415_v60, %v401_v25  ;;  %v422_v53 = vmul.f32 %v421_v61, %v400_v24  ;;  %v423_v56 = vmul.f32 %v421_v61, %v401_v25 }
  0xe1   : > { %v367_v51 = vpop.permute.xlu0 %366 }
  0xe2   : > { %v369_v54 = vsel %vm368_vm5, %v365_v1, %v367_v51  ;;  %v370_v55 = vsel %vm368_vm5, %v367_v51, %v365_v1 }
  0xe3   : > { %v371_v57 = vsel %vm357_vm6, %v370_v55, 0.0  ;;  %v372_v60 = vsel %vm358_vm7, %v369_v54, 0.0 }
  0xe4   : > { %v375_v61 = vmul.f32 %v374_v0, %v371_v57  ;;  %v376_v1 = vmul.f32 %v374_v0, %v372_v60  ;;  %v379_v17 = vmul.f32 %v378_v2, %v371_v57  ;;  %v380_v20 = vmul.f32 %v378_v2, %v372_v60  ;;  %v462_v21 = vpop.permute.xlu1 %461 }
  0xe5   : > { %v383_v24 = vmul.f32 %v382_v3, %v371_v57  ;;  %v384_v25 = vmul.f32 %v382_v3, %v372_v60  ;;  %v387_v51 = vmul.f32 %v386_v4, %v371_v57  ;;  %v388_v49 = vmul.f32 %v386_v4, %v372_v60 }
  0xe6   : > { %v406_v54 = vadd.f32 %v404_v33, %v375_v61  ;;  %v407_v0 = vadd.f32 %v405_v39, %v376_v1  ;;  %v412_v55 = vadd.f32 %v410_v44, %v379_v17  ;;  %v413_v2 = vadd.f32 %v411_v46, %v380_v20 }
  0xe7   : > { %v418_v43 = vadd.f32 %v416_v48, %v383_v24  ;;  %v419_v3 = vadd.f32 %v417_v52, %v384_v25  ;;  %v424_v42 = vadd.f32 %v422_v53, %v387_v51  ;;  %v425_v57 = vadd.f32 %v423_v56, %v388_v49 }
  0xe8   : > { %v439_v4 = vadd.f32 %v1870_v6, %v406_v54  ;;  %v719_v60 = vstv %s1920_s7  ;;  %v440_v33 = vadd.f32 %v1879_v10, %v407_v0  ;;  %v445_v39 = vadd.f32 %v1881_v11, %v412_v55  ;;  %s2281_s7 = sld [smem:[#allocation9 + $0x33]] }
  0xe9   : > { %v446_v44 = vadd.f32 %v1883_v12, %v413_v2  ;;  %v451_v46 = vadd.f32 %v1885_v13, %v418_v43  ;;  %v460_v6 = vpop.permute.xlu0 %459  ;;  %v452_v48 = vadd.f32 %v1893_v14, %v419_v3  ;;  %v457_v52 = vadd.f32 %v1895_v15, %v424_v42 }
  0xea   : > { %v463_v53 = vsel %vm430_vm0, %v460_v6, %v462_v21  ;;  %v464_v10 = vsel %vm430_vm0, %v462_v21, %v460_v6  ;;  %v458_v11 = vadd.f32 %v1897_v16, %v425_v57  ;;  %v600_v13 = vstv %s1960_s24  ;;  %s2321_s24 = sld [smem:[#allocation9 + $0x3a]] }
  0xeb   : > { %v465_v43 = vsel %vm1815_vm1, %v464_v10, 0.0  ;;  %v466_v12 = vsel %vm1826_vm2, %v463_v53, 0.0  ;;  %v606_v17 = vstv %s1962_s11  ;;  %v612_v20 = vstv %s1969_s26  ;;  %s2331_s11 = sld [smem:[#allocation9 + $0x3b]] }
  0xec   : > { %v469_v42 = vmul.f32 %v468_v5, %v465_v43  ;;  %v470_v14 = vmul.f32 %v468_v5, %v466_v12  ;;  %v475_v15 = vmul.f32 %v474_v7, %v465_v43  ;;  %v476_v56 = vmul.f32 %v474_v7, %v466_v12  ;;  %v527_v61 = vpop.permute.xlu1 %526  ;;  %s2340_s26 = sld [smem:[#allocation9 + $0x40]] }
  0xed   : > { %v481_v16 = vmul.f32 %v480_v8, %v465_v43  ;;  %v482_v1 = vmul.f32 %v480_v8, %v466_v12  ;;  %v487_v5 = vmul.f32 %v486_v9, %v465_v43  ;;  %v488_v24 = vmul.f32 %v486_v9, %v466_v12  ;;  %v2028_v9 = vpop.permute.xlu2 %591 }
  0xee   : > { %v471_v21 = vadd.f32 %v469_v42, %v439_v4  ;;  %v618_v7 = vstv %s1971_s27  ;;  %v472_v8 = vadd.f32 %v470_v14, %v440_v33  ;;  %v477_v25 = vadd.f32 %v475_v15, %v445_v39  ;;  %s2342_s27 = sld [smem:[#allocation9 + $0x41]] }
  0xef   : > { %v478_v51 = vadd.f32 %v476_v56, %v446_v44  ;;  %v483_v49 = vadd.f32 %v481_v16, %v451_v46  ;;  %v530_v54 = vsel %vm497_vm10, %v527_v61, %v529_v38  ;;  %v531_v0 = vsel %vm497_vm10, %v529_v38, %v527_v61 }
  0xf0   : > { %v624_v55 = vstv %s1973_s12  ;;  %v634_v2 = vstv %s1979_s13  ;;  %v484_v3 = vadd.f32 %v482_v1, %v452_v48  ;;  %v532_v57 = vsel %vm491_vm11, %v531_v0, 0.0  ;;  %s2344_s12 = sld [smem:[#allocation9 + $0x42]] }
  0xf1   : > { %v533_v38 = vsel %vm492_vm12, %v530_v54, 0.0  ;;  %v496_v4 = vpop.permute.xlu0 %495  ;;  %v2044_v33 = vmul.f32 %v624_v55, %v1752_v34  ;;  %v489_v39 = vadd.f32 %v487_v5, %v457_v52  ;;  %v490_v44 = vadd.f32 %v488_v24, %v458_v11  ;;  %s2348_s13 = sld [smem:[#allocation9 + $0x43]] }
  0xf2   : > { %v536_v46 = vmul.f32 %v535_v19, %v532_v57  ;;  %v2050_v6 = vmul.f32 %v634_v2, %v1752_v34  ;;  %v537_v48 = vmul.f32 %v535_v19, %v533_v38  ;;  %v542_v53 = vmul.f32 %v541_v22, %v532_v57 }
  0xf3   : > { %v543_v10 = vmul.f32 %v541_v22, %v533_v38  ;;  %v548_v52 = vmul.f32 %v547_v23, %v532_v57  ;;  %v549_v11 = vmul.f32 %v547_v23, %v533_v38  ;;  %v554_v43 = vmul.f32 %v553_v26, %v532_v57 }
  0xf4   : > { %v498_v19 = vsel %vm497_vm10, %v1899_v18, %v496_v4  ;;  %v499_v22 = vsel %vm497_vm10, %v496_v4, %v1899_v18  ;;  %v561_v12 = vpop.permute.xlu1 %560  ;;  %v555_v42 = vmul.f32 %v553_v26, %v533_v38  ;;  %v627_v15 = vperm.slane %v2044_v33, 0 }
  0xf5   : > { %v500_v23 = vsel %vm491_vm11, %v499_v22, 0.0  ;;  %v501_v14 = vsel %vm492_vm12, %v498_v19, 0.0  ;;  %v638_v57 = vperm.slane %v2050_v6, 1  ;;  %vm774_vm1 = vcmp.lt.s32.totalorder %v1782_v40, 113 }
  0xf6   : > { %v504_v18 = vmul.f32 %v503_v27, %v500_v23  ;;  %v505_v56 = vmul.f32 %v503_v27, %v501_v14  ;;  %v510_v26 = vmul.f32 %v509_v28, %v500_v23  ;;  %v511_v47 = vmul.f32 %v509_v28, %v501_v14 }
  0xf7   : > { %v516_v61 = vmul.f32 %v515_v29, %v500_v23  ;;  %v517_v16 = vmul.f32 %v515_v29, %v501_v14  ;;  %v522_v50 = vmul.f32 %v521_v31, %v500_v23  ;;  %v523_v1 = vmul.f32 %v521_v31, %v501_v14  ;;  %v706_v31 = vpop.permute.xlu2 %705 }
  0xf8   : > { %v506_v5 = vadd.f32 %v504_v18, %v471_v21  ;;  %v507_v24 = vadd.f32 %v505_v56, %v472_v8  ;;  %v512_v54 = vadd.f32 %v510_v26, %v477_v25  ;;  %v513_v0 = vadd.f32 %v511_v47, %v478_v51 }
  0xf9   : > { %v518_v55 = vadd.f32 %v516_v61, %v483_v49  ;;  %v559_v2 = vpop.permute.xlu0 %558  ;;  %v628_v27 = vperm.slane %v2044_v33, 1  ;;  %v637_v28 = vperm.slane %v2050_v6, 0  ;;  %v519_v38 = vadd.f32 %v517_v16, %v484_v3 }
  0xfa   : > { %v524_v29 = vadd.f32 %v522_v50, %v489_v39  ;;  %v525_v4 = vadd.f32 %v523_v1, %v490_v44  ;;  %v538_v19 = vadd.f32 %v536_v46, %v506_v5  ;;  %v539_v21 = vadd.f32 %v537_v48, %v507_v24 }
  0xfb   : > { %v544_v8 = vadd.f32 %v542_v53, %v512_v54  ;;  %v545_v25 = vadd.f32 %v543_v10, %v513_v0  ;;  %v550_v51 = vadd.f32 %v548_v52, %v518_v55  ;;  %v563_v49 = vsel %vm562_vm13, %v559_v2, %v561_v12 }
  0xfc   : > { %v564_v3 = vsel %vm562_vm13, %v561_v12, %v559_v2  ;;  %v704_v39 = vpop.permute.xlu1 %703  ;;  %v644_v44 = vstv %s2060_s0  ;;  %v654_v46 = vstv %s2072_s1  ;;  %v566_v53 = vsel %vm1858_vm4, %v563_v49, 0.0  ;;  %s2350_s0 = sld [smem:[#allocation9 + $0x3c]] }
  0xfd   : > { %v565_v48 = vsel %vm1846_vm3, %v564_v3, 0.0  ;;  %v708_v10 = vsel %vm707_vm14, %v704_v39, %v706_v31  ;;  %v709_v52 = vsel %vm707_vm14, %v706_v31, %v704_v39  ;;  %v570_v12 = vmul.f32 %v568_v32, %v566_v53  ;;  %s2353_s1 = sld [smem:[#allocation9 + $0x3d]] }
  0xfe   : > { %v569_v22 = vmul.f32 %v568_v32, %v565_v48  ;;  %v575_v23 = vmul.f32 %v574_v35, %v565_v48  ;;  %v576_v14 = vmul.f32 %v574_v35, %v566_v53  ;;  %v581_v18 = vmul.f32 %v580_v36, %v565_v48 }
  0xff   : > { %v582_v56 = vmul.f32 %v580_v36, %v566_v53  ;;  %v2572_v26 = vstv %s1864_s22  ;;  %v551_v50 = vadd.f32 %v549_v11, %v519_v38  ;;  %v556_v1 = vadd.f32 %v554_v43, %v524_v29  ;;  %s2268_s22 = sld [smem:[#allocation9 + $0x31]] }
 0x100   : > { %v587_v47 = vmul.f32 %v2572_v26, %v565_v48  ;;  %v2573_v61 = vmov %v2572_v26  ;;  %v557_v5 = vadd.f32 %v555_v42, %v525_v4  ;;  %v571_v32 = vadd.f32 %v569_v22, %v538_v19 }
 0x101   : > { %v588_v16 = vmul.f32 %v2573_v61, %v566_v53  ;;  %v572_v24 = vadd.f32 %v570_v12, %v539_v21  ;;  %v577_v35 = vadd.f32 %v575_v23, %v544_v8  ;;  %v578_v54 = vadd.f32 %v576_v14, %v545_v25  ;;  %v594_v19 = vpop.permute.xlu0 %593 }
 0x102   : > { %v583_v0 = vadd.f32 %v581_v18, %v550_v51  ;;  %v710_v36 = vsel %vm1939_vm8, %v708_v10, 0.0  ;;  %v711_v55 = vsel %vm1955_vm9, %v709_v52, 0.0  ;;  %v645_v11 = vmul.f32 %v644_v44, %v1752_v34 }
 0x103   : > { %v2146_v43 = vmul.f32 %v654_v46, %v1752_v34  ;;  %v584_v42 = vadd.f32 %v582_v56, %v551_v50  ;;  %v589_v2 = vadd.f32 %v587_v47, %v556_v1  ;;  %v590_v38 = vadd.f32 %v588_v16, %v557_v5 }
 0x104   : > { %v2574_v29 = vstv %s1891_s6  ;;  %v2158_v8 = vmul.f32 %v719_v60, %v710_v36  ;;  %v2162_v25 = vmul.f32 %v719_v60, %v711_v55  ;;  %v2166_v34 = vmul.f32 %v725_v62, %v710_v36  ;;  %s2279_s6 = sld [smem:[#allocation9 + $0x32]] }
 0x105   : > { %v2150_v4 = vmul.f32 %v2574_v29, %v710_v36  ;;  %v2575_v31 = vmov %v2574_v29  ;;  %v2170_v51 = vmul.f32 %v725_v62, %v711_v55  ;;  %v647_v49 = vperm.slane %v645_v11, 0 }
 0x106   : > { %v2154_v21 = vmul.f32 %v2575_v31, %v711_v55  ;;  %v648_v3 = vperm.slane %v645_v11, 1  ;;  %v657_v39 = vperm.slane %v2146_v43, 0  ;;  %v595_v60 = vsel %vm562_vm13, %v2028_v9, %v594_v19 }
 0x107   : > { %v596_v62 = vsel %vm562_vm13, %v594_v19, %v2028_v9  ;;  %v664_v44 = vstv %s2120_s2  ;;  %v674_v46 = vstv %s2130_s3  ;;  %v598_v53 = vsel %vm1858_vm4, %v595_v60, 0.0  ;;  %s2361_s2 = sld [smem:[#allocation9 + $0x3e]] }
 0x108   : > { %v597_v48 = vsel %vm1846_vm3, %v596_v62, 0.0  ;;  %v665_v10 = vmul.f32 %v664_v44, %v1749_v30  ;;  %v675_v52 = vmul.f32 %v674_v46, %v1749_v30  ;;  %v602_v22 = vmul.f32 %v600_v13, %v598_v53  ;;  %s2368_s3 = sld [smem:[#allocation9 + $0x3f]] }
 0x109   : > { %v601_v9 = vmul.f32 %v600_v13, %v597_v48  ;;  %v607_v12 = vmul.f32 %v606_v17, %v597_v48  ;;  %v608_v23 = vmul.f32 %v606_v17, %v598_v53  ;;  %v613_v14 = vmul.f32 %v612_v20, %v597_v48  ;;  %v737_v62 = vpop.permute.xlu0 %736 }
 0x10a   : > { %v614_v18 = vmul.f32 %v612_v20, %v598_v53  ;;  %v619_v56 = vmul.f32 %v618_v7, %v597_v48  ;;  %v620_v26 = vmul.f32 %v618_v7, %v598_v53  ;;  %v604_v13 = vadd.f32 %v602_v22, %v572_v24 }
 0x10b   : > { %v603_v47 = vadd.f32 %v601_v9, %v571_v32  ;;  %v609_v61 = vadd.f32 %v607_v12, %v577_v35  ;;  %v610_v16 = vadd.f32 %v608_v23, %v578_v54  ;;  %v658_v17 = vperm.slane %v2146_v43, 1  ;;  %v739_v43 = vpop.permute.xlu1 %738 }
 0x10c   : > { %v615_v50 = vadd.f32 %v613_v14, %v583_v0  ;;  %v616_v1 = vadd.f32 %v614_v18, %v584_v42  ;;  %v621_v5 = vadd.f32 %v619_v56, %v589_v2  ;;  %v622_v20 = vadd.f32 %v620_v26, %v590_v38  ;;  %v2230_v42 = vpop.permute.xlu2 %770 }
 0x10d   : > { %v631_v11 = vadd.f32 %v627_v15, %v603_v47  ;;  %v632_v7 = vadd.f32 %v628_v27, %v604_v13  ;;  %v641_v32 = vadd.f32 %v637_v28, %v609_v61  ;;  %v732_v24 = vmul.f32 %v731_v37, %v710_v36 }
 0x10e   : > { %v2226_v35 = vmul.f32 %v731_v37, %v711_v55  ;;  %v642_v54 = vadd.f32 %v638_v57, %v610_v16  ;;  %v651_v0 = vadd.f32 %v647_v49, %v615_v50  ;;  %v667_v15 = vperm.slane %v665_v10, 0 }
 0x10f   : > { %v668_v33 = vperm.slane %v665_v10, 1  ;;  %v677_v2 = vperm.slane %v675_v52, 0  ;;  %v678_v27 = vperm.slane %v675_v52, 1  ;;  %v652_v38 = vadd.f32 %v648_v3, %v616_v1 }
 0x110   : > { %v661_v28 = vadd.f32 %v657_v39, %v621_v5  ;;  %v684_v36 = vstv %s2173_s4  ;;  %v694_v37 = vstv %s2183_s18  ;;  %v662_v55 = vadd.f32 %v658_v17, %v622_v20  ;;  %s2385_s4 = sld [smem:[#allocation9 + $0x44]] }
 0x111   : > { %v671_v29 = vadd.f32 %v667_v15, %v631_v11  ;;  %v672_v6 = vadd.f32 %v668_v33, %v632_v7  ;;  %v681_v57 = vadd.f32 %v677_v2, %v641_v32  ;;  %v682_v19 = vadd.f32 %v678_v27, %v642_v54  ;;  %s2397_s18 = sld [smem:[#allocation9 + $0x45]] }
 0x112   : > { %v685_v31 = vmul.f32 %v684_v36, %v1749_v30  ;;  %v695_v49 = vmul.f32 %v694_v37, %v1749_v30  ;;  %v745_v60 = vstv %s2191_s19  ;;  %v751_v44 = vstv %s2201_s20  ;;  %s2403_s19 = sld [smem:[#allocation9 + $0x46]] }
 0x113   : > { %v716_v3 = vadd.f32 %v2150_v4, %v671_v29  ;;  %v757_v39 = vstv %s2211_s21  ;;  %v763_v46 = vstv %s2213_s16  ;;  %v717_v9 = vadd.f32 %v2154_v21, %v672_v6  ;;  %v804_v20 = vpop.permute.xlu1 %803  ;;  %s2405_s20 = sld [smem:[#allocation9 + $0x47]] }
 0x114   : > { %v687_v48 = vperm.slane %v685_v31, 0  ;;  %v688_v53 = vperm.slane %v685_v31, 1  ;;  %v697_v10 = vperm.slane %v695_v49, 0  ;;  %v698_v52 = vperm.slane %v695_v49, 1  ;;  %v806_v11 = vpop.permute.xlu2 %805  ;;  %s2414_s21 = sld [smem:[#allocation11]] }
 0x115   : > { %v722_v30 = vadd.f32 %v2158_v8, %v681_v57  ;;  %v740_v22 = vsel %vm707_vm14, %v737_v62, %v739_v43  ;;  %v741_v4 = vsel %vm707_vm14, %v739_v43, %v737_v62  ;;  %v723_v18 = vadd.f32 %v2162_v25, %v682_v19  ;;  %s2420_s16 = sld [smem:[#allocation11 + $0x1]] }
 0x116   : > { %v691_v12 = vadd.f32 %v687_v48, %v651_v0  ;;  %v692_v23 = vadd.f32 %v688_v53, %v652_v38  ;;  %v701_v14 = vadd.f32 %v697_v10, %v661_v28  ;;  %v702_v56 = vadd.f32 %v698_v52, %v662_v55  ;;  %v773_v28 = vpop.permute.xlu0 %772 }
 0x117   : > { %v742_v21 = vsel %vm1939_vm8, %v740_v22, 0.0  ;;  %v743_v8 = vsel %vm1955_vm9, %v741_v4, 0.0  ;;  %v2576_v26 = vshra.s32 %v1782_v40, 4  ;;  %v2579_v61 = vshra.s32 %v1793_v41, 4 }
 0x118   : > { %v728_v13 = vadd.f32 %v2166_v34, %v691_v12  ;;  %v729_v25 = vadd.f32 %v2170_v51, %v692_v23  ;;  %v746_v17 = vmul.f32 %v745_v60, %v742_v21  ;;  %v747_v50 = vmul.f32 %v745_v60, %v743_v8 }
 0x119   : > { %vm2264_vm15 = vcmp.lt.s32.totalorder %v2576_v26, 15  ;;  %vm2274_vm0 = vcmp.lt.s32.totalorder %v2579_v61, 15  ;;  %v752_v1 = vmul.f32 %v751_v44, %v742_v21  ;;  %v753_v5 = vmul.f32 %v751_v44, %v743_v8 }
 0x11a   : > { %v734_v41 = vadd.f32 %v732_v24, %v701_v14  ;;  %v758_v34 = vmul.f32 %v757_v39, %v742_v21  ;;  %v759_v51 = vmul.f32 %v757_v39, %v743_v8  ;;  %v764_v7 = vmul.f32 %v763_v46, %v742_v21  ;;  %vm768_vm2 = vmand %vm2264_vm15, %vm1846_vm3 }
 0x11b   : > { %v735_v32 = vadd.f32 %v2226_v35, %v702_v56  ;;  %v765_v54 = vmul.f32 %v763_v46, %v743_v8  ;;  %v812_v0 = vstv %s2237_s23  ;;  %v748_v43 = vadd.f32 %v746_v17, %v716_v3  ;;  %vm769_vm5 = vmand %vm2274_vm0, %vm1858_vm4  ;;  %v838_v23 = vpop.permute.xlu1 %837  ;;  %s2422_s23 = sld [smem:[#allocation11 + $0x2]] }
 0x11c   : > { %v749_v15 = vadd.f32 %v747_v50, %v717_v9  ;;  %v754_v33 = vadd.f32 %v752_v1, %v722_v30  ;;  %v755_v2 = vadd.f32 %v753_v5, %v723_v18  ;;  %v760_v24 = vadd.f32 %v758_v34, %v728_v13  ;;  %v2338_v14 = vpop.permute.xlu2 %868  ;;  %vm900_vm6 = vmand %vm2264_vm15, %vm1939_vm8 }
 0x11d   : > { %v818_v35 = vstv %s2243_s30  ;;  %v824_v27 = vstv %s2245_s10  ;;  %v807_v38 = vsel %vm774_vm1, %v804_v20, %v806_v11  ;;  %v761_v36 = vadd.f32 %v759_v51, %v729_v25  ;;  %vm901_vm7 = vmand %vm2274_vm0, %vm1955_vm9  ;;  %s2424_s30 = sld [smem:[#allocation11 + $0x3]] }
 0x11e   : > { %v766_v37 = vadd.f32 %v764_v7, %v734_v41  ;;  %v808_v55 = vsel %vm774_vm1, %v806_v11, %v804_v20  ;;  %v809_v29 = vsel %vm768_vm2, %v807_v38, 0.0  ;;  %v767_v6 = vadd.f32 %v765_v54, %v735_v32  ;;  %v836_v20 = vpop.permute.xlu0 %835 }
 0x11f   : > { %v830_v57 = vstv %s2253_s14  ;;  %v810_v19 = vsel %vm769_vm5, %v808_v55, 0.0  ;;  %v780_v31 = vstv %s2256_s15  ;;  %v813_v49 = vmul.f32 %v812_v0, %v809_v29  ;;  %s2585_s15 = sshll.u32 %s1721_s28, 3 }
 0x120   : > { %v819_v60 = vmul.f32 %v818_v35, %v809_v29  ;;  %v825_v62 = vmul.f32 %v824_v27, %v809_v29  ;;  %v786_v3 = vstv %s2268_s22  ;;  %v814_v44 = vmul.f32 %v812_v0, %v810_v19  ;;  %s294_s22 = scalar_lea.vmem [#allocation12], %s2585_s15 }
 0x121   : > { %v792_v39 = vstv %s2279_s6  ;;  %v798_v46 = vstv %s2281_s7  ;;  %v775_v48 = vsel %vm774_vm1, %v2230_v42, %v773_v28  ;;  %v820_v53 = vmul.f32 %v818_v35, %v810_v19  ;;  %s1076_s6 = sshll.u32 %s294_s22, 4  ;;  %s1077_s6 = int_to_ptr.vmem [resolvable:$true] %s1076_s6 }
 0x122   : > { %v826_v10 = vmul.f32 %v824_v27, %v810_v19  ;;  %v776_v52 = vsel %vm774_vm1, %v773_v28, %v2230_v42  ;;  %v777_v9 = vsel %vm768_vm2, %v775_v48, 0.0  ;;  %v831_v63 = vmul.f32 %v830_v57, %v809_v29 }
 0x123   : > { %v778_v30 = vsel %vm769_vm5, %v776_v52, 0.0  ;;  %v781_v22 = vmul.f32 %v780_v31, %v777_v9  ;;  %v787_v4 = vmul.f32 %v786_v3, %v777_v9  ;;  %v793_v12 = vmul.f32 %v792_v39, %v777_v9 }
 0x124   : > { %v782_v42 = vmul.f32 %v780_v31, %v778_v30  ;;  %v788_v18 = vmul.f32 %v786_v3, %v778_v30  ;;  %v794_v56 = vmul.f32 %v792_v39, %v778_v30  ;;  %v799_v59 = vmul.f32 %v798_v46, %v777_v9  ;;  %v905_v31 = vpop.permute.xlu2 %904 }
 0x125   : > { %v783_v21 = vadd.f32 %v781_v22, %v748_v43  ;;  %v789_v8 = vadd.f32 %v787_v4, %v754_v33  ;;  %v795_v26 = vadd.f32 %v793_v12, %v760_v24  ;;  %v800_v13 = vmul.f32 %v798_v46, %v778_v30 }
 0x126   : > { %v784_v25 = vadd.f32 %v782_v42, %v749_v15  ;;  %v790_v61 = vadd.f32 %v788_v18, %v755_v2  ;;  %v796_v17 = vadd.f32 %v794_v56, %v761_v36  ;;  %v832_v50 = vmul.f32 %v830_v57, %v810_v19  ;;  %v903_v19 = vpop.permute.xlu1 %902 }
 0x127   : > { %v801_v1 = vadd.f32 %v799_v59, %v766_v37  ;;  %vm839_vm3 = vcmp.lt.s32.totalorder %v1782_v40, 112  ;;  %v845_v5 = vstv %s2311_s8  ;;  %v802_v11 = vadd.f32 %v800_v13, %v767_v6  ;;  %s1063_s8 = scalar_lea.sflag [#allocation4], %s1721_s28 }
 0x128   : > { %v815_v41 = vadd.f32 %v813_v49, %v783_v21  ;;  %v821_v34 = vadd.f32 %v819_v60, %v789_v8  ;;  %v827_v51 = vadd.f32 %v825_v62, %v795_v26  ;;  %v816_v7 = vadd.f32 %v814_v44, %v784_v25 }
 0x129   : > { %v822_v32 = vadd.f32 %v820_v53, %v790_v61  ;;  %v828_v54 = vadd.f32 %v826_v10, %v796_v17  ;;  %v851_v0 = vstv %s2314_s9  ;;  %v857_v43 = vstv %s2321_s24 }
 0x12a   : > { %v863_v15 = vstv %s2331_s11  ;;  %v840_v33 = vsel %vm839_vm3, %v836_v20, %v838_v23  ;;  %v841_v2 = vsel %vm839_vm3, %v838_v23, %v836_v20  ;;  %v833_v24 = vadd.f32 %v831_v63, %v801_v1  ;;  %v871_v23 = vpop.permute.xlu0 %870 }
 0x12b   : > { %v842_v35 = vsel %vm2264_vm15, %v840_v33, 0.0  ;;  %v843_v27 = vsel %vm2274_vm0, %v841_v2, 0.0  ;;  %vm906_vm4 = vcmp.lt.s32.totalorder %v1782_v40, 111  ;;  %v834_v49 = vadd.f32 %v832_v50, %v802_v11 }
 0x12c   : > { %v846_v38 = vmul.f32 %v845_v5, %v842_v35  ;;  %v847_v28 = vmul.f32 %v845_v5, %v843_v27  ;;  %v852_v36 = vmul.f32 %v851_v0, %v842_v35  ;;  %v853_v37 = vmul.f32 %v851_v0, %v843_v27 }
 0x12d   : > { %v858_v55 = vmul.f32 %v857_v43, %v842_v35  ;;  %v859_v29 = vmul.f32 %v857_v43, %v843_v27  ;;  %v864_v6 = vmul.f32 %v863_v15, %v842_v35  ;;  %v865_v57 = vmul.f32 %v863_v15, %v843_v27 }
 0x12e   : > { %v912_v60 = vstv %s2340_s26  ;;  %v918_v62 = vstv %s2342_s27  ;;  %v924_v3 = vstv %s2344_s12  ;;  %v848_v44 = vadd.f32 %v846_v38, %v815_v41  ;;  %s1513_s27 = scalar_lea.hbm %s2525_s5, 16 }
 0x12f   : > { %v849_v39 = vadd.f32 %v847_v28, %v816_v7  ;;  %v854_v46 = vadd.f32 %v852_v36, %v821_v34  ;;  %v855_v48 = vadd.f32 %v853_v37, %v822_v32  ;;  %v860_v53 = vadd.f32 %v858_v55, %v827_v51 }
 0x130   : > { %v861_v10 = vadd.f32 %v859_v29, %v828_v54  ;;  %v907_v52 = vsel %vm906_vm4, %v903_v19, %v905_v31  ;;  %v908_v9 = vsel %vm906_vm4, %v905_v31, %v903_v19  ;;  %v866_v30 = vadd.f32 %v864_v6, %v833_v24  ;;  %v2430_v19 = vld [vmem:[%s1727_s17 + $0x1] ss:$4 sm:$0x3]  ;;  %v938_v31 = vpop.permute.xlu1 %937 }
 0x131   : > { %v867_v22 = vadd.f32 %v865_v57, %v834_v49  ;;  %v909_v4 = vsel %vm900_vm6, %v907_v52, 0.0  ;;  %v910_v12 = vsel %vm901_vm7, %v908_v9, 0.0  ;;  %v930_v42 = vstv %s2348_s13  ;;  %v2443_v9 = vld [vmem:[%s1727_s17 + $0x3] ss:$4 sm:$0x3] }
 0x132   : > { %v877_v18 = vstv %s2350_s0  ;;  %v883_v56 = vstv %s2353_s1  ;;  %v889_v59 = vstv %s2361_s2  ;;  %v913_v21 = vmul.f32 %v912_v60, %v909_v4 }
 0x133   : > { %v914_v8 = vmul.f32 %v912_v60, %v910_v12  ;;  %v919_v26 = vmul.f32 %v918_v62, %v909_v4  ;;  %v920_v13 = vmul.f32 %v918_v62, %v910_v12  ;;  %v925_v63 = vmul.f32 %v924_v3, %v909_v4 }
 0x134   : > { %v895_v25 = vstv %s2368_s3  ;;  %v872_v61 = vsel %vm839_vm3, %v2338_v14, %v871_v23  ;;  %v873_v17 = vsel %vm839_vm3, %v871_v23, %v2338_v14  ;;  %v926_v50 = vmul.f32 %v924_v3, %v910_v12 }
 0x135   : > { %v931_v1 = vmul.f32 %v930_v42, %v909_v4  ;;  %v874_v5 = vsel %vm2264_vm15, %v872_v61, 0.0  ;;  %v875_v20 = vsel %vm2274_vm0, %v873_v17, 0.0  ;;  %v932_v38 = vmul.f32 %v930_v42, %v910_v12 }
 0x136   : > { %v878_v11 = vmul.f32 %v877_v18, %v874_v5  ;;  %v879_v41 = vmul.f32 %v877_v18, %v875_v20  ;;  %v884_v34 = vmul.f32 %v883_v56, %v874_v5  ;;  %v885_v51 = vmul.f32 %v883_v56, %v875_v20 }
 0x137   : > { %v890_v14 = vmul.f32 %v889_v59, %v874_v5  ;;  %v891_v7 = vmul.f32 %v889_v59, %v875_v20  ;;  %v896_v32 = vmul.f32 %v895_v25, %v874_v5  ;;  %v897_v54 = vmul.f32 %v895_v25, %v875_v20 }
 0x138   : > { %v880_v0 = vadd.f32 %v878_v11, %v848_v44  ;;  %v881_v43 = vadd.f32 %v879_v41, %v849_v39  ;;  %v886_v15 = vadd.f32 %v884_v34, %v854_v46  ;;  %v887_v33 = vadd.f32 %v885_v51, %v855_v48  ;;  %v2433_v44 = vld [vmem:[%s1727_s17 + $0x2] ss:$4 sm:$0x3]  ;;  %v936_v39 = vpop.permute.xlu0 %935 }
 0x139   : > { %v892_v2 = vadd.f32 %v890_v14, %v860_v53  ;;  %v893_v24 = vadd.f32 %v891_v7, %v861_v10  ;;  %v898_v35 = vadd.f32 %v896_v32, %v866_v30  ;;  %v899_v27 = vadd.f32 %v897_v54, %v867_v22  ;;  %v2438_v53 = vld [vmem:[%s1727_s17] ss:$4 sm:$0x3]  ;;  %s1306_s17 = sshll.u32 %s1639_s25, 3 }
 0x13a   : > { %v944_v28 = vstv %s2385_s4  ;;  %v950_v36 = vstv %s2397_s18  ;;  %v956_v37 = vstv %s2403_s19  ;;  %v915_v55 = vadd.f32 %v913_v21, %v880_v0  ;;  %s1074_s14 = scalar_lea.hbm %s2525_s5, %s1306_s17 }
 0x13b   : > { %v916_v29 = vadd.f32 %v914_v8, %v881_v43  ;;  %v921_v6 = vadd.f32 %v919_v26, %v886_v15  ;;  %v922_v57 = vadd.f32 %v920_v13, %v887_v33  ;;  %v927_v49 = vadd.f32 %v925_v63, %v892_v2  ;;  %s1078_s7 = sshll.u32 %s1074_s14, 4  ;;  %s1079_s7 = int_to_ptr.hbm [resolvable:$true] %s1078_s7 }
 0x13c   : > { %v928_v60 = vadd.f32 %v926_v50, %v893_v24  ;;  %v933_v62 = vadd.f32 %v931_v1, %v898_v35  ;;  %v934_v3 = vadd.f32 %v932_v38, %v899_v27  ;;  %v962_v46 = vstv %s2405_s20  ;;  %s1507_s9 = sshra.s32 %s1079_s7, 4  ;;  %s1508_s9 = int_to_ptr.hbm [resolvable:$true] %s1507_s9 }
 0x13d   : > { %v968_v48 = vstv %s2414_s21  ;;  %v976_v10 = vperm.slane %v2438_v53, 0  ;;  %v977_v52 = vperm.slane %v2438_v53, 1  ;;  %v994_v30 = vstv %s2420_s16  ;;  %s1509_s24 = scalar_lea.hbm %s1508_s9, 8  ;;  %p1514_p12 = scmp.lt.s32.totalorder %s1508_s9, %s2525_s5 }
 0x13e   : > { %v1003_v22 = vperm.slane %v2430_v19, 0  ;;  %v1004_v4 = vperm.slane %v2430_v19, 1  ;;  %v1017_v12 = vstv %s2422_s23  ;;  %v1026_v23 = vperm.slane %v2433_v44, 0  ;;  %p1510_p1 = scmp.ne.s32.totalorder %s1508_s9, %s1509_s24  ;;  %p1515_p7 = scmp.lt.s32.totalorder %s1513_s27, %s1509_s24 }
 0x13f   : > { %v1027_v42 = vperm.slane %v2433_v44, 1  ;;  %v939_v18 = vsel %vm906_vm4, %v936_v39, %v938_v31  ;;  %v940_v56 = vsel %vm906_vm4, %v938_v31, %v936_v39  ;;  %v1040_v59 = vstv %s2424_s30 }
 0x140   : > { %v1050_v21 = vperm.slane %v2443_v9, 1  ;;  %v941_v8 = vsel %vm900_vm6, %v939_v18, 0.0  ;;  %v942_v26 = vsel %vm901_vm7, %v940_v56, 0.0  ;;  %v1049_v19 = vperm.slane %v2443_v9, 0  ;;  %p1511_p3 = pnand %p1510_p1, %p1690_p5  ;;  %p1516_p8 = por %p1515_p7, %p1514_p12 }
 0x141   : > { %v945_v13 = vmul.f32 %v944_v28, %v941_v8  ;;  %v946_v63 = vmul.f32 %v944_v28, %v942_v26  ;;  %v951_v25 = vmul.f32 %v950_v36, %v941_v8  ;;  %v952_v40 = vmul.f32 %v950_v36, %v942_v26 }
 0x142   : > { %v957_v61 = vmul.f32 %v956_v37, %v941_v8  ;;  %v958_v17 = vmul.f32 %v956_v37, %v942_v26  ;;  %v963_v50 = vmul.f32 %v962_v46, %v941_v8  ;;  %v964_v1 = vmul.f32 %v962_v46, %v942_v26  ;;  %p1512_p4 = pneg %p1511_p3 }
 0x143   : > { %v947_v5 = vadd.f32 %v945_v13, %v915_v55  ;;  %v948_v47 = vadd.f32 %v946_v63, %v916_v29  ;;  %v953_v58 = vadd.f32 %v951_v25, %v921_v6  ;;  %v954_v20 = vadd.f32 %v952_v40, %v922_v57 }
 0x144   : > { %v959_v11 = vadd.f32 %v957_v61, %v927_v49  ;;  %v960_v41 = vadd.f32 %v958_v17, %v928_v60  ;;  %v965_v16 = vadd.f32 %v963_v50, %v933_v62  ;;  %v966_v34 = vadd.f32 %v964_v1, %v934_v3  ;;  %p1517_p9 = pnand %p1516_p8, %p1512_p4 }
 0x145   : > { %v969_v45 = vadd.f32 %v968_v48, %v947_v5  ;;  %v970_v51 = vadd.f32 %v968_v48, %v948_v47  ;;  %v995_v14 = vadd.f32 %v994_v30, %v953_v58  ;;  %v996_v7 = vadd.f32 %v994_v30, %v954_v20 }
 0x146   : > { %v1018_v32 = vadd.f32 %v1017_v12, %v959_v11  ;;  %v1019_v54 = vadd.f32 %v1017_v12, %v960_v41  ;;  %v1041_v0 = vadd.f32 %v1040_v59, %v965_v16  ;;  %v1042_v43 = vadd.f32 %v1040_v59, %v966_v34 }
 0x147   : > { %v971_v15 = vmul.f32 0.1, %v969_v45  ;;  %v972_v33 = vmul.f32 0.1, %v970_v51  ;;  %v997_v2 = vmul.f32 0.1, %v995_v14  ;;  %v2582_v48 = vlaneseq }
 0x148   : > { %v998_v24 = vmul.f32 0.1, %v996_v7  ;;  %v1020_v35 = vmul.f32 0.1, %v1018_v32  ;;  %v1021_v27 = vmul.f32 0.1, %v1019_v54 }
 0x149   : > { %v973_v38 = vmax.f32 %v969_v45, %v971_v15  ;;  %v974_v28 = vmax.f32 %v970_v51, %v972_v33  ;;  %v999_v36 = vmax.f32 %v995_v14, %v997_v2  ;;  %v1043_v37 = vmul.f32 0.1, %v1041_v0 }
 0x14a   : > { %v1000_v55 = vmax.f32 %v996_v7, %v998_v24  ;;  %v1022_v29 = vmax.f32 %v1018_v32, %v1020_v35  ;;  %v1023_v6 = vmax.f32 %v1019_v54, %v1021_v27  ;;  %v1044_v57 = vmul.f32 0.1, %v1042_v43 }
 0x14b   : > { %v981_v31 = vadd.f32 %v977_v52, %v974_v28  ;;  %vm985_vm8 = vcmask 1040384   ;;  %v1045_v62 = vmax.f32 %v1041_v0, %v1043_v37  ;;  %v980_v44 = vadd.f32 %v976_v10, %v973_v38 }
 0x14c   : > { %v1008_v49 = vadd.f32 %v1004_v4, %v1000_v55  ;;  %v1031_v60 = vadd.f32 %v1027_v42, %v1023_v6  ;;  %v1046_v3 = vmax.f32 %v1042_v43, %v1044_v57  ;;  %v1007_v46 = vadd.f32 %v1003_v22, %v999_v36 }
 0x14d   : > { %v984_v39 = vrot.slane %v981_v31, 7  ;;  %vm2473_vm9 = vcmp.lt.s32.totalorder %v2582_v48, 256  ;;  %v1030_v30 = vadd.f32 %v1026_v23, %v1022_v29  ;;  %v1053_v42 = vadd.f32 %v1049_v19, %v1045_v62 }
 0x14e   : > { %v1011_v9 = vrot.slane %v1008_v49, 7  ;;  %v1034_v52 = vrot.slane %v1031_v60, 7  ;;  %v1054_v12 = vadd.f32 %v1050_v21, %v1046_v3 }
 0x14f   : > { %v986_v4 = vsel %vm985_vm8, %v980_v44, %v984_v39 }
 0x150   : > { %v1057_v10 = vrot.slane %v1054_v12, 7  ;;  %992 = vst.msk [vmem:[%s294_s22] ss:$4 sm:$0x3] %vm2473_vm9, %v986_v4  ;;  %v1012_v22 = vsel %vm985_vm8, %v1007_v46, %v1011_v9  ;;  %v1035_v18 = vsel %vm985_vm8, %v1030_v30, %v1034_v52 }
 0x151   : > { %1293 = vst.msk [vmem:[%s294_s22 + $0x1] ss:$4 sm:$0x3] %vm2473_vm9, %v1012_v22 }
 0x152   : > { %1296 = vst.msk [vmem:[%s294_s22 + $0x2] ss:$4 sm:$0x3] %vm2473_vm9, %v1035_v18  ;;  %v1058_v23 = vsel %vm985_vm8, %v1053_v42, %v1057_v10 }
 0x153   : > { %1299 = vst.msk [vmem:[%s294_s22 + $0x3] ss:$4 sm:$0x3] %vm2473_vm9, %v1058_v23 }
 0x154   : > { %1520 = shalt.err (!%p1517_p9)
}
 0x155   : > { %1325 = dma.vmem_to_hbm [thread:$0]  (%p1690_p5), %s1077_s6, 128, %s1079_s7, %s1063_s8  }
 0x156 PF: > { %s2586_s28 = sld [smem:[#allocation18_spill]] }
 0x157   : > { %s2588_s1 = sld [smem:[#allocation21_spill]] }
 0x15c   : > { %s1090_s2 = sand.u32 1, %s2586_s28  }
 0x15d   : > { %p2589_p10 = scmp.ge.s32.totalorder %s2588_s1, 2  ;;  %s1091_s3 = scalar_lea.sflag [#allocation4], %s1090_s2 }
 0x15f   : > { %p1345_p13 = pnand %p2589_p10, %p1694_p6 }
 0x161   : > { %p1346_p11 = pneg %p1345_p13 }
 0x163   : > { %1554 = dma.done.wait (%p1346_p11), %s1091_s3, 128  }
 0x164   : > { %1556 = vsyncadd (%p1346_p11), %s1091_s3, 4294967168  ;;  %s2590_s21 = sld [smem:[#allocation22_spill]] }
 0x165   : > { %s2591_s18 = sld [smem:[#allocation19_spill]] }
 0x166   : > { %s2592_s19 = sld [smem:[#allocation20_spill]] }
 0x167   : > { %s2593_s20 = sld [smem:[#allocation23_spill]] }
 0x16a   : > { %p21_p0 = scmp.ge.s32.totalorder %s2590_s21, 4  }
 0x16c   :  { %23 = sbr.rel (!%p21_p0) target bundleno = 14 (0xe), region = 109 }
 0x171   :  { %1097 = vsyncpa [#allocation3], 1 }
 0x172   :  { %1099 = vsyncpa [#allocation3 + $0x1], 1 }
 0x173   :  { %1100 = vsyncpa [#allocation4], 1 }
 0x174   :  { %1102 = vsyncpa [#allocation4 + $0x1], 1 }
 0x175   :  { %1103 = vsyncpa [#allocation5], 1 }
 0x176   :  { %1105 = vsyncpa [#allocation5 + $0x1], 1 }
 0x177   :  { %1106 = vsyncpa [#allocation6], 1 }
 0x178   :  { %1108 = vsyncpa [#allocation6 + $0x1], 1 }
 0x179   :  { %1109 = vsyncpa [#allocation10], 1 }

</bundles_post_ra>
